<compile_context>
chip_gen: v7x
topology: tpu7x:2x2x1
jax: 0.10.0
libtpu: 0.0.40
codegen_flags: <defaults>
</compile_context>

<pallas_src>
import functools

import jax
import jax.numpy as jnp
from jax import lax
from jax.experimental import pallas as pl
from jax.experimental.pallas import tpu as pltpu


# ----------------------------------------------------------------------------
# Pallas kernel: 2-layer MLP + fused heads + Q / diag-exp, one lane-dense slab
# ----------------------------------------------------------------------------
def _make_mlp_heads_kernel(A, dim_l0, h_pad, tile_n):
    off_mu = 1
    off_l0 = 1 + A
    off_q = 1 + A + dim_l0            # Q column
    off_d = off_q + 1                 # A columns of exp(diag(L))
    diag_pos = [i * (i + 3) // 2 for i in range(A)]   # diag offsets inside L0 vec

    def kernel(x_ref, act_ref, w1_ref, b1_ref, w2_ref, b2_ref,
               wh_ref, bh_ref, out_ref):
        # ---- MLP trunk: bf16 operands into the MXU, f32 accumulate ----
        x = x_ref[...].astype(jnp.bfloat16)
        h = jnp.dot(x, w1_ref[...], preferred_element_type=jnp.float32) + b1_ref[...]
        h = jnp.maximum(h, 0.0)
        h = jnp.dot(h.astype(jnp.bfloat16), w2_ref[...],
                    preferred_element_type=jnp.float32) + b2_ref[...]
        h = jnp.maximum(h, 0.0)

        # ---- single fused head matmul -> (tile_n, h_pad) ----
        y = jnp.dot(h.astype(jnp.bfloat16), wh_ref[...],
                    preferred_element_type=jnp.float32) + bh_ref[...]

        lanes = lax.broadcasted_iota(jnp.int32, (tile_n, h_pad), 1)
        # tanh applies to the mu / L0 lanes (and harmlessly to zero-padded lanes);
        # lane 0 (value) is left linear.
        heads = jnp.where(lanes == 0, y, jnp.tanh(y))
        out = heads

        # ---- NAF Q term + exp(diag(L)) (cheap per-row VPU/EUP work) ----
        act = act_ref[...]                        # (tile_n, 1)
        value = y[:, 0:1]                         # (tile_n, 1)
        quad = jnp.zeros((tile_n, 1), jnp.float32)
        for i in range(A):
            mu_i = heads[:, off_mu + i:off_mu + i + 1]
            ld_i = heads[:, off_l0 + diag_pos[i]:off_l0 + diag_pos[i] + 1]
            d_i = jnp.exp(ld_i)                   # exp of L diagonal entry i
            quad = quad + (act - mu_i) ** 2 * (d_i * d_i)
            out = jnp.where(lanes == off_d + i, d_i, out)
        q_col = value - 0.5 * quad
        out = jnp.where(lanes == off_q, q_col, out)

        out_ref[...] = out                        # one unmasked lane-dense store

    return kernel


def _run_mlp_heads(x, act, pp, tile_n):
    n, f = x.shape
    A = pp["A"]
    dim_l0 = pp["dim_l0"]
    h_pad = pp["wh"].shape[1]
    assert tile_n % 8 == 0

    n_pad = ((n + tile_n - 1) // tile_n) * tile_n
    if n_pad != n:
        x = jnp.pad(x, ((0, n_pad - n), (0, 0)))
        act = jnp.pad(act, ((0, n_pad - n), (0, 0)))

    kernel = _make_mlp_heads_kernel(A, dim_l0, h_pad, tile_n)
    const = lambda i: (0, 0)

    slab = pl.pallas_call(
        kernel,
        out_shape=jax.ShapeDtypeStruct((n_pad, h_pad), jnp.float32),
        grid_spec=pltpu.PrefetchScalarGridSpec(
            num_scalar_prefetch=0,
            grid=(n_pad // tile_n,),
            in_specs=[
                pl.BlockSpec((tile_n, f), lambda i: (i, 0)),   # X tiles over N
                pl.BlockSpec((tile_n, 1), lambda i: (i, 0)),   # action column
                pl.BlockSpec((f, 32), const),                  # weights: VMEM-resident
                pl.BlockSpec((1, 32), const),
                pl.BlockSpec((32, 32), const),
                pl.BlockSpec((1, 32), const),
                pl.BlockSpec((32, h_pad), const),
                pl.BlockSpec((1, h_pad), const),
            ],
            out_specs=pl.BlockSpec((tile_n, h_pad), lambda i: (i, 0)),
        ),
        compiler_params=pltpu.CompilerParams(
            dimension_semantics=("parallel",)),
    )(x, act, pp["w1"], pp["b1"], pp["w2"], pp["b2"], pp["wh"], pp["bh"])
    return slab[:n]


# ----------------------------------------------------------------------------
# One-time parameter packing (fused head weights, bf16 MXU operands)
# ----------------------------------------------------------------------------
def prepare_params(params, A):
    dim_l0 = params["wl"].shape[1]
    h_real = 1 + A + dim_l0
    h_need = h_real + 1 + A                       # + Q column + exp-diag columns
    h_pad = ((max(h_need, 128) + 127) // 128) * 128

    wh = jnp.concatenate([params["wv"], params["wmu"], params["wl"]], axis=1)
    bh = jnp.concatenate([params["bv"], params["bmu"], params["bl"]], axis=1)
    wh = jnp.pad(wh, ((0, 0), (0, h_pad - h_real)))
    bh = jnp.pad(bh, ((0, 0), (0, h_pad - h_real)))

    return {
        "w1": params["w1"].astype(jnp.bfloat16), "b1": params["b1"],
        "w2": params["w2"].astype(jnp.bfloat16), "b2": params["b2"],
        "wh": wh.astype(jnp.bfloat16), "bh": bh,
        "A": A, "dim_l0": dim_l0,
    }


# ----------------------------------------------------------------------------
# Full forward pass (mirrors NonGraph_Model.forward)
# ----------------------------------------------------------------------------
def nongraph_model_forward(observation, prepared_params, N, A, action_min, action_max,
                           action=None, sample_key=None, tile_n=128):
    X_in = jnp.asarray(observation[0], jnp.float32)        # (N, F)
    _adj = jnp.asarray(observation[1], jnp.float32)         # unused (as in torch)
    RL_indice = jnp.asarray(observation[2], jnp.float32)    # (N,)

    if action is not None:
        act_col = jnp.asarray(action, jnp.float32).reshape(N, 1)
    else:
        act_col = jnp.zeros((N, 1), jnp.float32)

    dim_l0 = prepared_params["dim_l0"]
    slab = _run_mlp_heads(X_in, act_col, prepared_params, tile_n)   # (N, h_pad)

    value = slab[:, 0:1]                                    # (N, 1)
    mu2d = slab[:, 1:1 + A]                                  # (N, A)
    l0 = slab[:, 1 + A:1 + A + dim_l0]                       # (N, dimL0)
    off_q = 1 + A + dim_l0
    q_col = slab[:, off_q:off_q + 1]                         # (N, 1)
    diag_exp = slab[:, off_q + 1:off_q + 1 + A]              # (N, A)

    # ---- L / P construction (glue; same semantics as the torch source) ----
    rows, cols = jnp.tril_indices(A)
    L = jnp.zeros((N, A, A), jnp.float32).at[:, rows, cols].set(l0)
    di = jnp.arange(A)
    L = L.at[:, di, di].set(diag_exp)                        # exp(diag) from the kernel
    P = L * jnp.swapaxes(L, 1, 2)                            # elementwise, as in torch

    Q = q_col if action is not None else None                # computed in the kernel

    # ---- MVN sample, clamp, mask ----
    # TODO(synk): torch uses MultivariateNormal with torch RNG; sampling here uses
    # JAX RNG so sampled actions differ numerically (distribution is identical).
    cov = jnp.linalg.inv(P)
    key = sample_key if sample_key is not None else jax.random.PRNGKey(0)
    sampled = jax.random.multivariate_normal(key, mu2d, cov)           # (N, A)
    sampled = jnp.clip(sampled, action_min, action_max)
    sampled = sampled * RL_indice.reshape(N, 1)
    if sampled.shape[-1] == 1:                                         # torch .squeeze(-1)
        sampled = sampled[..., 0]

    action_dict = {"action": sampled,
                   "action_min": action_min,
                   "action_max": action_max}
    return action_dict, Q, value


# ----------------------------------------------------------------------------
# Deterministic parameter init (synthetic; shapes from __init__)
# ----------------------------------------------------------------------------
def init_params(key, F, A):
    dim_l0 = int(A * (A + 1) / 2)
    ks = jax.random.split(key, 10)

    def lin(kw, kb, fan_in, fan_out):
        bound = 1.0 / jnp.sqrt(fan_in)
        w = jax.random.uniform(kw, (fan_in, fan_out), jnp.float32, -bound, bound)
        b = jax.random.uniform(kb, (1, fan_out), jnp.float32, -bound, bound)
        return w, b

    w1, b1 = lin(ks[0], ks[1], F, 32)
    w2, b2 = lin(ks[2], ks[3], 32, 32)
    wv, bv = lin(ks[4], ks[5], 32, 1)
    wmu, bmu = lin(ks[6], ks[7], 32, A)
    wl, bl = lin(ks[8], ks[9], 32, dim_l0)
    return {"w1": w1, "b1": b1, "w2": w2, "b2": b2,
            "wv": wv, "bv": bv, "wmu": wmu, "bmu": bmu, "wl": wl, "bl": bl}


if __name__ == "__main__":
    N, F, A = 256, 8, 2                      # vehicles, feature length, action dim
    TILE_N = 128                             # two grid steps, both TCs on v7x
    action_min, action_max = -1.0, 1.0

    root = jax.random.PRNGKey(0)
    k_param, k_x, k_adj, k_mask, k_act, k_samp = jax.random.split(root, 6)

    params = prepare_params(init_params(k_param, F, A), A)   # one-time head fusion

    X_in = jax.random.normal(k_x, (N, F), jnp.float32)
    adjacency = jax.random.normal(k_adj, (N, N), jnp.float32)           # unused
    RL_indice = (jax.random.uniform(k_mask, (N,)) > 0.3).astype(jnp.float32)
    observation = (X_in, adjacency, RL_indice)

    prev_action = jax.random.normal(k_act, (N,), jnp.float32)           # feeds the Q path

    action_dict, Q, value = nongraph_model_forward(
        observation, params, N, A, action_min, action_max,
        action=prev_action, sample_key=k_samp, tile_n=TILE_N)

    jax.block_until_ready((action_dict["action"], Q, value))
    assert action_dict["action"].shape == (N, A)
    assert Q.shape == (N, 1)
    assert value.shape == (N, 1)
    print("KERNEL_OK")
</pallas_src>

<mosaic_0001>
module attributes {stable_mosaic.version = 11 : i64} {
  func.func @kernel(%arg0: i32, %arg1: memref<128x8xf32, #tpu.memory_space<vmem>>, %arg2: memref<128x1xf32, #tpu.memory_space<vmem>>, %arg3: memref<8x32xbf16, #tpu.memory_space<vmem>>, %arg4: memref<1x32xf32, #tpu.memory_space<vmem>>, %arg5: memref<32x32xbf16, #tpu.memory_space<vmem>>, %arg6: memref<1x32xf32, #tpu.memory_space<vmem>>, %arg7: memref<32x128xbf16, #tpu.memory_space<vmem>>, %arg8: memref<1x128xf32, #tpu.memory_space<vmem>>, %arg9: memref<128x128xf32, #tpu.memory_space<vmem>>) attributes {dimension_semantics = [#tpu.dimension_semantics<parallel>], iteration_bounds = array<i64: 2>, scalar_prefetch = 0 : i64, scratch_operands = 0 : i64, tpu.core_type = #tpu.core_type<tc>, window_params = [{transform_indices = @transform_0, window_bounds = array<i64: 128, 8>}, {transform_indices = @transform_1, window_bounds = array<i64: 128, 1>}, {pipeline_mode = #tpu.pipeline_mode<synchronous>, transform_indices = @transform_2, window_bounds = array<i64: 8, 32>}, {pipeline_mode = #tpu.pipeline_mode<synchronous>, transform_indices = @transform_3, window_bounds = array<i64: 1, 32>}, {pipeline_mode = #tpu.pipeline_mode<synchronous>, transform_indices = @transform_4, window_bounds = array<i64: 32, 32>}, {pipeline_mode = #tpu.pipeline_mode<synchronous>, transform_indices = @transform_5, window_bounds = array<i64: 1, 32>}, {pipeline_mode = #tpu.pipeline_mode<synchronous>, transform_indices = @transform_6, window_bounds = array<i64: 32, 128>}, {pipeline_mode = #tpu.pipeline_mode<synchronous>, transform_indices = @transform_7, window_bounds = array<i64: 1, 128>}, {transform_indices = @transform_8, window_bounds = array<i64: 128, 128>}]} {
    %c0 = arith.constant 0 : index
    %c0_0 = arith.constant 0 : index
    %0 = vector.load %arg1[%c0, %c0_0] : memref<128x8xf32, #tpu.memory_space<vmem>>, vector<128x8xf32>
    %1 = arith.truncf %0 : vector<128x8xf32> to vector<128x8xbf16>
    %c0_1 = arith.constant 0 : index
    %c0_2 = arith.constant 0 : index
    %2 = vector.load %arg3[%c0_1, %c0_2] : memref<8x32xbf16, #tpu.memory_space<vmem>>, vector<8x32xbf16>
    %cst = arith.constant dense<0.000000e+00> : vector<128x32xf32>
    %3 = tpu.matmul %1, %2, %cst {dimension_numbers = #tpu.dot_dimension_numbers<[1], [0], [0], [1], [0, 0, 1, 1], [], []>} : vector<128x8xbf16>, vector<8x32xbf16>, vector<128x32xf32> -> vector<128x32xf32>
    %c0_3 = arith.constant 0 : index
    %c0_4 = arith.constant 0 : index
    %4 = vector.load %arg4[%c0_3, %c0_4] : memref<1x32xf32, #tpu.memory_space<vmem>>, vector<1x32xf32>
    %5 = vector.broadcast %4 : vector<1x32xf32> to vector<128x32xf32>
    %6 = arith.addf %3, %5 : vector<128x32xf32>
    %cst_5 = arith.constant 0.000000e+00 : f32
    %7 = vector.broadcast %cst_5 : f32 to vector<128x32xf32>
    %8 = arith.maximumf %6, %7 : vector<128x32xf32>
    %9 = arith.truncf %8 : vector<128x32xf32> to vector<128x32xbf16>
    %c0_6 = arith.constant 0 : index
    %c0_7 = arith.constant 0 : index
    %10 = vector.load %arg5[%c0_6, %c0_7] : memref<32x32xbf16, #tpu.memory_space<vmem>>, vector<32x32xbf16>
    %cst_8 = arith.constant dense<0.000000e+00> : vector<128x32xf32>
    %11 = tpu.matmul %9, %10, %cst_8 {dimension_numbers = #tpu.dot_dimension_numbers<[1], [0], [0], [1], [0, 0, 1, 1], [], []>} : vector<128x32xbf16>, vector<32x32xbf16>, vector<128x32xf32> -> vector<128x32xf32>
    %c0_9 = arith.constant 0 : index
    %c0_10 = arith.constant 0 : index
    %12 = vector.load %arg6[%c0_9, %c0_10] : memref<1x32xf32, #tpu.memory_space<vmem>>, vector<1x32xf32>
    %13 = vector.broadcast %12 : vector<1x32xf32> to vector<128x32xf32>
    %14 = arith.addf %11, %13 : vector<128x32xf32>
    %cst_11 = arith.constant 0.000000e+00 : f32
    %15 = vector.broadcast %cst_11 : f32 to vector<128x32xf32>
    %16 = arith.maximumf %14, %15 : vector<128x32xf32>
    %17 = arith.truncf %16 : vector<128x32xf32> to vector<128x32xbf16>
    %c0_12 = arith.constant 0 : index
    %c0_13 = arith.constant 0 : index
    %18 = vector.load %arg7[%c0_12, %c0_13] : memref<32x128xbf16, #tpu.memory_space<vmem>>, vector<32x128xbf16>
    %cst_14 = arith.constant dense<0.000000e+00> : vector<128x128xf32>
    %19 = tpu.matmul %17, %18, %cst_14 {dimension_numbers = #tpu.dot_dimension_numbers<[1], [0], [0], [1], [0, 0, 1, 1], [], []>} : vector<128x32xbf16>, vector<32x128xbf16>, vector<128x128xf32> -> vector<128x128xf32>
    %c0_15 = arith.constant 0 : index
    %c0_16 = arith.constant 0 : index
    %20 = vector.load %arg8[%c0_15, %c0_16] : memref<1x128xf32, #tpu.memory_space<vmem>>, vector<1x128xf32>
    %21 = vector.broadcast %20 : vector<1x128xf32> to vector<128x128xf32>
    %22 = arith.addf %19, %21 : vector<128x128xf32>
    %23 = tpu.iota {dimensions = array<i32: 1>} : vector<128x128xi32>
    %c0_i32 = arith.constant 0 : i32
    %24 = vector.broadcast %c0_i32 : i32 to vector<128x128xi32>
    %25 = arith.cmpi eq, %23, %24 : vector<128x128xi32>
    %26 = math.tanh %22 : vector<128x128xf32>
    %27 = arith.select %25, %22, %26 : vector<128x128xi1>, vector<128x128xf32>
    %c0_17 = arith.constant 0 : index
    %c0_18 = arith.constant 0 : index
    %28 = vector.load %arg2[%c0_17, %c0_18] : memref<128x1xf32, #tpu.memory_space<vmem>>, vector<128x1xf32>
    %29 = vector.extract_strided_slice %22 {offsets = [0, 0], sizes = [128, 1], strides = [1, 1]} : vector<128x128xf32> to vector<128x1xf32>
    %cst_19 = arith.constant 0.000000e+00 : f32
    %30 = vector.broadcast %cst_19 : f32 to vector<128x1xf32>
    %31 = vector.extract_strided_slice %27 {offsets = [0, 1], sizes = [128, 1], strides = [1, 1]} : vector<128x128xf32> to vector<128x1xf32>
    %32 = vector.extract_strided_slice %27 {offsets = [0, 3], sizes = [128, 1], strides = [1, 1]} : vector<128x128xf32> to vector<128x1xf32>
    %33 = math.exp %32 : vector<128x1xf32>
    %34 = arith.subf %28, %31 : vector<128x1xf32>
    %35 = arith.mulf %34, %34 : vector<128x1xf32>
    %36 = arith.mulf %33, %33 : vector<128x1xf32>
    %37 = arith.mulf %35, %36 : vector<128x1xf32>
    %38 = arith.addf %30, %37 : vector<128x1xf32>
    %c7_i32 = arith.constant 7 : i32
    %39 = vector.broadcast %c7_i32 : i32 to vector<128x128xi32>
    %40 = arith.cmpi eq, %23, %39 : vector<128x128xi32>
    %41 = vector.shape_cast %33 : vector<128x1xf32> to vector<128x1xf32>
    %42 = vector.broadcast %41 : vector<128x1xf32> to vector<128x128xf32>
    %43 = arith.select %40, %42, %27 : vector<128x128xi1>, vector<128x128xf32>
    %44 = vector.extract_strided_slice %27 {offsets = [0, 2], sizes = [128, 1], strides = [1, 1]} : vector<128x128xf32> to vector<128x1xf32>
    %45 = vector.extract_strided_slice %27 {offsets = [0, 5], sizes = [128, 1], strides = [1, 1]} : vector<128x128xf32> to vector<128x1xf32>
    %46 = math.exp %45 : vector<128x1xf32>
    %47 = arith.subf %28, %44 : vector<128x1xf32>
    %48 = arith.mulf %47, %47 : vector<128x1xf32>
    %49 = arith.mulf %46, %46 : vector<128x1xf32>
    %50 = arith.mulf %48, %49 : vector<128x1xf32>
    %51 = arith.addf %38, %50 : vector<128x1xf32>
    %c8_i32 = arith.constant 8 : i32
    %52 = vector.broadcast %c8_i32 : i32 to vector<128x128xi32>
    %53 = arith.cmpi eq, %23, %52 : vector<128x128xi32>
    %54 = vector.shape_cast %46 : vector<128x1xf32> to vector<128x1xf32>
    %55 = vector.broadcast %54 : vector<128x1xf32> to vector<128x128xf32>
    %56 = arith.select %53, %55, %43 : vector<128x128xi1>, vector<128x128xf32>
    %cst_20 = arith.constant 5.000000e-01 : f32
    %57 = vector.broadcast %cst_20 : f32 to vector<128x1xf32>
    %58 = arith.mulf %57, %51 : vector<128x1xf32>
    %59 = arith.subf %29, %58 : vector<128x1xf32>
    %c6_i32 = arith.constant 6 : i32
    %60 = vector.broadcast %c6_i32 : i32 to vector<128x128xi32>
    %61 = arith.cmpi eq, %23, %60 : vector<128x128xi32>
    %62 = vector.shape_cast %59 : vector<128x1xf32> to vector<128x1xf32>
    %63 = vector.broadcast %62 : vector<128x1xf32> to vector<128x128xf32>
    %64 = arith.select %61, %63, %56 : vector<128x128xi1>, vector<128x128xf32>
    %c0_21 = arith.constant 0 : index
    %c0_22 = arith.constant 0 : index
    %65 = vector.load %arg9[%c0_21, %c0_22] : memref<128x128xf32, #tpu.memory_space<vmem>>, vector<128x128xf32>
    tpu.vector_store %arg9[%c0_21, %c0_22], %64 {strides = array<i32>} : memref<128x128xf32, #tpu.memory_space<vmem>>, vector<128x128xf32>,
    return
  }
  func.func @transform_0(%arg0: i32) -> (i32, i32) {
    %c0_i32 = arith.constant 0 : i32
    %c0_i32_0 = arith.constant 0 : i32
    return %arg0, %c0_i32 : i32, i32
  }
  func.func @transform_1(%arg0: i32) -> (i32, i32) {
    %c0_i32 = arith.constant 0 : i32
    %c0_i32_0 = arith.constant 0 : i32
    return %arg0, %c0_i32 : i32, i32
  }
  func.func @transform_2(%arg0: i32) -> (i32, i32) {
    %c0_i32 = arith.constant 0 : i32
    %c0_i32_0 = arith.constant 0 : i32
    %c0_i32_1 = arith.constant 0 : i32
    return %c0_i32, %c0_i32_0 : i32, i32
  }
  func.func @transform_3(%arg0: i32) -> (i32, i32) {
    %c0_i32 = arith.constant 0 : i32
    %c0_i32_0 = arith.constant 0 : i32
    %c0_i32_1 = arith.constant 0 : i32
    return %c0_i32, %c0_i32_0 : i32, i32
  }
  func.func @transform_4(%arg0: i32) -> (i32, i32) {
    %c0_i32 = arith.constant 0 : i32
    %c0_i32_0 = arith.constant 0 : i32
    %c0_i32_1 = arith.constant 0 : i32
    return %c0_i32, %c0_i32_0 : i32, i32
  }
  func.func @transform_5(%arg0: i32) -> (i32, i32) {
    %c0_i32 = arith.constant 0 : i32
    %c0_i32_0 = arith.constant 0 : i32
    %c0_i32_1 = arith.constant 0 : i32
    return %c0_i32, %c0_i32_0 : i32, i32
  }
  func.func @transform_6(%arg0: i32) -> (i32, i32) {
    %c0_i32 = arith.constant 0 : i32
    %c0_i32_0 = arith.constant 0 : i32
    %c0_i32_1 = arith.constant 0 : i32
    return %c0_i32, %c0_i32_0 : i32, i32
  }
  func.func @transform_7(%arg0: i32) -> (i32, i32) {
    %c0_i32 = arith.constant 0 : i32
    %c0_i32_0 = arith.constant 0 : i32
    %c0_i32_1 = arith.constant 0 : i32
    return %c0_i32, %c0_i32_0 : i32, i32
  }
  func.func @transform_8(%arg0: i32) -> (i32, i32) {
    %c0_i32 = arith.constant 0 : i32
    %c0_i32_0 = arith.constant 0 : i32
    return %arg0, %c0_i32 : i32, i32
  }
}

</mosaic_0001>

<bundles_post_ra>
// kernel: tpu_custom_call.1
= control target key start
LH: loop header
LB: loop body
LE: loop exit
PB: predicated region body
PF: predicated region fallthrough
CT: control target
= control target key end

     0   :  { %13 = vsyncpa [#allocation3], 0  ;;  %s2922_s0 = inlined_call_operand.vmem [shape: f32[256,8], index: 0, kind: input, shape index: {}]   ;;  %s2923_s1 = inlined_call_operand.vmem [shape: f32[256,1], index: 1, kind: input, shape index: {}]   ;;  %s2924_s2 = inlined_call_operand.vmem [shape: bf16[8,32], index: 2, kind: input, shape index: {}]   ;;  %s2925_s3 = inlined_call_operand.vmem [shape: f32[1,32], index: 3, kind: input, shape index: {}]   ;;  %s2926_s4 = inlined_call_operand.vmem [shape: bf16[32,32], index: 4, kind: input, shape index: {}]   ;;  %s2927_s5 = inlined_call_operand.vmem [shape: f32[1,32], index: 5, kind: input, shape index: {}]   ;;  %s2928_s6 = inlined_call_operand.vmem [shape: bf16[32,128], index: 6, kind: input, shape index: {}]   ;;  %s2929_s7 = inlined_call_operand.vmem [shape: f32[1,128], index: 7, kind: input, shape index: {}]   ;;  %s2930_s8 = inlined_call_operand.hbm [shape: f32[256,128], index: 8, kind: output, shape index: {}]  }
   0x1   :  { %15 = vsyncpa [#allocation3 + $0x1], 0  ;;  %s2065_s27 = smov 0   ;;  %s2067_s28 = smov 0  }
   0x2   :  { %s2069_s29 = smov 0   ;;  %s2071_s30 = smov 0  }
   0x3 LB: > { %s2086_s9 = sadd.s32 4294967295, %s2008_s30   ;;  %s1687_s10 = sadd.s32 4294967294, %s2008_s30   ;;  %s2008_s30 = sphi %s2071_s30, %s2974_s30   ;;  %s2004_s29 = sphi %s2069_s29, %s2973_s29   ;;  %s2000_s28 = sphi %s2067_s28, %s2972_s28   ;;  %s1996_s27 = sphi %s2065_s27, %s2971_s27  }
   0x4   : > { %s2090_s11 = sadd.s32 1, %s2008_s30   ;;  %s206_s12 = sadd.s32 1, %s2004_s29 }
   0x5   : > { %s203_s13 = ssub.s32 %s2008_s30, %s2090_s11  ;;  %p216_p0 = scmp.ne.s32.totalorder %s2004_s29, %s2000_s28 }
   0x6   : > { %p204_p1 = scmp.eq.s32.totalorder %s203_s13, 0  ;;  %p217_p2 = scmp.eq.s32.totalorder %s2086_s9, 1 }
   0x7   : > { %p222_p3 = scmp.ne.s32.totalorder %s2000_s28, %s1996_s27  ;;  %p223_p4 = scmp.eq.s32.totalorder %s1687_s10, 1 }
   0x8   : > { %s2101_s14 = scalar_select %p204_p1, %s2004_s29, %s206_s12  }
   0x9   : > { %p2103_p5 = por %p217_p2, %p216_p0  ;;  %p2107_p6 = por %p223_p4, %p222_p3 }
   0xa   : > { %p1690_p7 = scmp.ge.s32.totalorder %s2008_s30, 1  ;;  %p277_p8 = scmp.lt.s32.totalorder %s2008_s30, 3 }
   0xc   : > { %p278_p9 = pnand %p1690_p7, %p277_p8 }
   0xe   : > { %281 = sbr.rel (%p278_p9) target bundleno = 1141 (0x475), region = 52 }
  0x15   : > { %v354_v0 = vld [vmem:[%s2924_s2] sm:$0xf]  ;;  %vm387_vm0 = vcmask 1043456   ;;  %s1692_s19 = sshll.u32 %s2086_s9, 4  ;;  %vm362_vm1 = vcmask 64512   ;;  %v1879_v27 = vld [vmem:[%s2926_s4 + $0x8] sm:$0xff]  }
  0x16   : > { %v1878_v1 = vld [vmem:[%s2926_s4] sm:$0xff]   ;;  %1822 = vmatprep.subr.msk.bf16.mxu0 %vm387_vm0, %v354_v0  ;;  %v389_v2 = vsel %vm387_vm0, %v354_v0, 0  ;;  %p317_p10 = scmp.lt.s32.totalorder %s1692_s19, 31  ;;  %1823 = vmatprep.subr.msk.bf16.mxu1 %vm387_vm0, %v354_v0  ;;  %vm535_vm2 = vcmask 261120   ;;  %s2011_s10 = smov 127  }
  0x17   : > { %1763 = vmatpush3.bf16.msra.mxu0 %v389_v2  ;;  %1821 = vmatpush3.bf16.msra.mxu1 %v389_v2  ;;  %v1880_v28 = vld [vmem:[%s2928_s6] sm:$0xff]   ;;  %s2012_s12 = smov 126   ;;  %s2013_s13 = smov 123  }
  0x18   : > { %s2976_s19 = smov (!%p317_p10, %s1692_s19), 31  ;;  %1780 = vmatprep.subr.bf16.mxu1 %v1878_v1  ;;  %1800 = vmatprep.subr.bf16.mxu0 %v1880_v28  ;;  %v1696_v29 = vld [vmem:[%s2925_s3] ss:$0 sm:$0xff]  ;;  %s2014_s17 = smov 125  }
  0x19   : > { %s1693_s22 = sshll.u32 %s2976_s19, 3  ;;  %s313_s19 = sand.u32 1, %s2000_s28  }
  0x1a   : > { %s320_s25 = scalar_lea.vmem %s2922_s0, %s1693_s22  ;;  %s2556_s21 = scalar_lea.vmem %s2923_s1, %s1693_s22 }
  0x1b   : > { %v330_v3 = vld [vmem:[%s320_s25] sm:$0xff]  ;;  %v331_v4 = vld [vmem:[%s320_s25 + $0x8] sm:$0xff]  ;;  %v332_v5 = vld [vmem:[%s320_s25 + $0x10] sm:$0xff]  ;;  %s1691_s22 = sshll.u32 %s313_s19, 7  ;;  %s1732_s24 = sshll.u32 %s2086_s9, 11 }
  0x1c   : > { %v346_v6 = vpack.c.bf16 %v331_v4, %v330_v3  ;;  %v333_v7 = vld [vmem:[%s320_s25 + $0x18] sm:$0xff]  ;;  %v334_v8 = vld [vmem:[%s320_s25 + $0x20] sm:$0xff]  ;;  %v335_v9 = vld [vmem:[%s320_s25 + $0x28] sm:$0xff]  ;;  %s2776_s23 = scalar_lea.vmem [#allocation2], %s1691_s22  ;;  %s2881_s9 = scalar_lea.sflag [#allocation3], %s313_s19 }
  0x1d   : > { %v347_v10 = vpack.c.bf16 %v333_v7, %v332_v5  ;;  %v348_v11 = vpack.c.bf16 %v335_v9, %v334_v8  ;;  %v338_v12 = vld [vmem:[%s320_s25 + $0x40] sm:$0xff]  ;;  %v339_v13 = vld [vmem:[%s320_s25 + $0x48] sm:$0xff]  ;;  %v340_v14 = vld [vmem:[%s320_s25 + $0x50] sm:$0xff] }
  0x1e   : > { %1764 = vmatprep.mubr.msk.bf16.mxu0 %vm362_vm1, %v346_v6  ;;  %v341_v15 = vld [vmem:[%s320_s25 + $0x58] sm:$0xff]  ;;  %v350_v16 = vpack.c.bf16 %v339_v13, %v338_v12  ;;  %v342_v18 = vld [vmem:[%s320_s25 + $0x60] sm:$0xff]  ;;  %v343_v19 = vld [vmem:[%s320_s25 + $0x68] sm:$0xff] }
  0x1f   : > { %1765 = vmatmul.mubr.msk.bf16.vlgmr.msra.gmra.mrb[0].mxu0 %vm362_vm1, %v347_v10  ;;  %v351_v17 = vpack.c.bf16 %v341_v15, %v340_v14  ;;  %v336_v20 = vld [vmem:[%s320_s25 + $0x30] sm:$0xff]  ;;  %v337_v21 = vld [vmem:[%s320_s25 + $0x38] sm:$0xff]  ;;  %v352_v22 = vpack.c.bf16 %v343_v19, %v342_v18 }
  0x20   : > { %1768 = vmatprep.mubr.msk.bf16.mxu0 %vm362_vm1, %v348_v11  ;;  %1772 = vmatprep.mubr.msk.bf16.mxu1 %vm362_vm1, %v350_v16  ;;  %v349_v23 = vpack.c.bf16 %v337_v21, %v336_v20  ;;  %v344_v24 = vld [vmem:[%s320_s25 + $0x70] sm:$0xff]  ;;  %v345_v25 = vld [vmem:[%s320_s25 + $0x78] sm:$0xff]  ;;  %s1613_s25 = sshll.u32 %s2776_s23, 4  ;;  %s2874_s25 = int_to_ptr.vmem [resolvable:$true] %s1613_s25 }
  0x21   : > { %1773 = vmatmul.mubr.msk.bf16.vlgmr.msra.gmra.mrb[0].mxu1 %vm362_vm1, %v351_v17  ;;  %v353_v26 = vpack.c.bf16 %v345_v25, %v344_v24  ;;  %1801 = vmatpush3.bf16.msra.mxu0 %v1880_v28 }
  0x22   : > { %1776 = vmatprep.mubr.msk.bf16.mxu1 %vm362_vm1, %v352_v22  ;;  %1781 = vmatpush3.bf16.msra.mxu1 %v1878_v1  ;;  %v1881_v22 = vld [vmem:[%s2928_s6 + $0x8] sm:$0xff]  }
  0x23   : > { %1782 = vmatprep.subr.bf16.mxu1 %v1879_v27  ;;  %1802 = vmatprep.subr.bf16.mxu0 %v1881_v22 }
  0x25   : > { %1803 = vmatpush3.bf16.msra.mxu0 %v1881_v22 }
  0x26   : > { %1783 = vmatpush3.bf16.msra.mxu1 %v1879_v27 }
  0x27   : > { %1769 = vmatmul.mubr.msk.bf16.gmra.mrb[4].mxu0 %vm362_vm1, %v349_v23  ;;  %v1705_v23 = vld [vmem:[%s2927_s5] ss:$0 sm:$0xff] }
  0x29   : > { %1777 = vmatmul.mubr.msk.bf16.gmra.mrb[4].mxu1 %vm362_vm1, %v353_v26 }
  0xf2   : > { %v1766_v30 = vpop.f32.mrb[0].mxu0 }
  0xf3   : > { %v434_v31 = vadd.f32 %v1766_v30, %v1696_v29  ;;  %v425_v32 = vpop.f32.mrb[1].mxu0 }
  0xf4   : > { %v426_v33 = vadd.f32 %v1696_v29, %v425_v32  ;;  %v1767_v34 = vpop.f32.mrb[2].mxu0  ;;  %v1774_v37 = vpop.f32.mrb[0].mxu1 }
  0xf5   : > { %v437_v35 = vadd.f32 %v1767_v34, %v1696_v29  ;;  %v428_v36 = vpop.f32.mrb[3].mxu0  ;;  %v466_v39 = vadd.f32 %v1774_v37, %v1696_v29  ;;  %v457_v40 = vpop.f32.mrb[1].mxu1  ;;  %v490_v41 = vmax.f32 %v434_v31, 0.0 }
  0xf6   : > { %v429_v38 = vadd.f32 %v1696_v29, %v428_v36  ;;  %v458_v43 = vadd.f32 %v1696_v29, %v457_v40  ;;  %v1775_v44 = vpop.f32.mrb[2].mxu1  ;;  %v488_v45 = vmax.f32 %v426_v33, 0.0 }
  0xf7   : > { %v491_v42 = vmax.f32 %v437_v35, 0.0  ;;  %v498_v47 = vmax.f32 %v466_v39, 0.0  ;;  %v469_v48 = vadd.f32 %v1775_v44, %v1696_v29  ;;  %v460_v49 = vpop.f32.mrb[3].mxu1 }
  0xf8   : > { %v489_v46 = vmax.f32 %v429_v38, 0.0  ;;  %v496_v51 = vmax.f32 %v458_v43, 0.0  ;;  %v461_v52 = vadd.f32 %v1696_v29, %v460_v49 }
  0xf9   : > { %v505_v50 = vpack.c.bf16 %v491_v42, %v490_v41  ;;  %v499_v55 = vmax.f32 %v469_v48, 0.0 }
  0xfa   : > { %v504_v53 = vpack.c.bf16 %v489_v46, %v488_v45  ;;  %v1770_v54 = vpop.f32.mrb[4].mxu0  ;;  %v497_v58 = vmax.f32 %v461_v52, 0.0 }
  0xfb   : > { %v450_v56 = vadd.f32 %v1770_v54, %v1696_v29  ;;  %v441_v57 = vpop.f32.mrb[5].mxu0  ;;  %v509_v61 = vpack.c.bf16 %v499_v55, %v498_v47 }
  0xfc   : > { %v442_v59 = vadd.f32 %v1696_v29, %v441_v57  ;;  %v1771_v60 = vpop.f32.mrb[6].mxu0  ;;  %1784 = vmatprep.mubr.msk.bf16.mxu1 %vm535_vm2, %v504_v53  ;;  %v508_v1 = vpack.c.bf16 %v497_v58, %v496_v51  ;;  %v1778_v2 = vpop.f32.mrb[4].mxu1 }
  0xfd   : > { %v494_v62 = vmax.f32 %v450_v56, 0.0  ;;  %v453_v63 = vadd.f32 %v1771_v60, %v1696_v29  ;;  %v444_v0 = vpop.f32.mrb[7].mxu0  ;;  %1785 = vmatmul.mubr.msk.bf16.vlgmr.msra.gmra.mrb[8].mxu1 %vm535_vm2, %v505_v50  ;;  %v482_v5 = vadd.f32 %v1778_v2, %v1696_v29  ;;  %v473_v6 = vpop.f32.mrb[5].mxu1 }
  0xfe   : > { %v492_v3 = vmax.f32 %v442_v59, 0.0  ;;  %v445_v4 = vadd.f32 %v1696_v29, %v444_v0  ;;  %v474_v8 = vadd.f32 %v1696_v29, %v473_v6  ;;  %v1779_v9 = vpop.f32.mrb[6].mxu1 }
  0xff   : > { %v495_v7 = vmax.f32 %v453_v63, 0.0  ;;  %v502_v11 = vmax.f32 %v482_v5, 0.0  ;;  %v485_v12 = vadd.f32 %v1779_v9, %v1696_v29  ;;  %v476_v13 = vpop.f32.mrb[7].mxu1 }
 0x100   : > { %v493_v10 = vmax.f32 %v445_v4, 0.0  ;;  %v500_v15 = vmax.f32 %v474_v8, 0.0  ;;  %v477_v16 = vadd.f32 %v1696_v29, %v476_v13 }
 0x101   : > { %v507_v14 = vpack.c.bf16 %v495_v7, %v494_v62  ;;  %v503_v18 = vmax.f32 %v485_v12, 0.0 }
 0x102   : > { %v506_v17 = vpack.c.bf16 %v493_v10, %v492_v3  ;;  %v501_v19 = vmax.f32 %v477_v16, 0.0  ;;  %v2010_v16 = vmov 3  }
 0x103   : > { %v511_v20 = vpack.c.bf16 %v503_v18, %v502_v11  ;;  %1872 = vset.pattern.permute.xlu1 %v2010_v16  ;;  %1873 = vset.pattern.permute.xlu0 %v2010_v16 }
 0x104   : > { %1788 = vmatprep.mubr.msk.bf16.mxu1 %vm535_vm2, %v506_v17  ;;  %v510_v21 = vpack.c.bf16 %v501_v19, %v500_v15  ;;  %v2170_v17 = vld [vmem:[%s2929_s7] ss:$0 sm:$0xff] }
 0x105   : > { %1789 = vmatmul.mubr.msk.bf16.gmra.mrb[12].mxu1 %vm535_vm2, %v507_v14 }
 0x106   : > { %1792 = vmatprep.mubr.msk.bf16.mxu1 %vm535_vm2, %v508_v1 }
 0x10d   : > { %1793 = vmatmul.mubr.msk.bf16.gmra.mrb[16].mxu1 %vm535_vm2, %v509_v61 }
 0x10e   : > { %1796 = vmatprep.mubr.msk.bf16.mxu1 %vm535_vm2, %v510_v21 }
 0x115   : > { %1797 = vmatmul.mubr.msk.bf16.gmra.mrb[20].mxu1 %vm535_vm2, %v511_v20 }
 0x1d0   : > { %v1786_v24 = vpop.f32.mrb[8].mxu1 }
 0x1d1   : > { %v603_v25 = vadd.f32 %v1786_v24, %v1705_v23  ;;  %v594_v26 = vpop.f32.mrb[9].mxu1 }
 0x1d2   : > { %v595_v27 = vadd.f32 %v1705_v23, %v594_v26  ;;  %v1787_v28 = vpop.f32.mrb[10].mxu1 }
 0x1d3   : > { %v606_v29 = vadd.f32 %v1787_v28, %v1705_v23  ;;  %v597_v30 = vpop.f32.mrb[11].mxu1  ;;  %v659_v32 = vmax.f32 %v603_v25, 0.0  ;;  %v825_v25 = vlaneseq }
 0x1d4   : > { %v598_v31 = vadd.f32 %v1705_v23, %v597_v30  ;;  %v657_v34 = vmax.f32 %v595_v27, 0.0 }
 0x1d5   : > { %v660_v33 = vmax.f32 %v606_v29, 0.0  ;;  %v2187_v27 = vand.u32 127, %v825_v25 }
 0x1d6   : > { %v658_v35 = vmax.f32 %v598_v31, 0.0 }
 0x1d7   : > { %v674_v36 = vpack.c.bf16 %v660_v33, %v659_v32  ;;  %vm827_vm3 = vcmp.eq.s32.totalorder %v2187_v27, 0  ;;  %vm1116_vm4 = vcmp.eq.s32.totalorder %v2187_v27, 7  ;;  %vm1373_vm5 = vcmp.eq.s32.totalorder %v2187_v27, 8 }
 0x1d8   : > { %v673_v37 = vpack.c.bf16 %v658_v35, %v657_v34  ;;  %v1790_v38 = vpop.f32.mrb[12].mxu1  ;;  %vm1486_vm6 = vcmp.eq.s32.totalorder %v2187_v27, 6 }
 0x1d9   : > { %v619_v39 = vadd.f32 %v1790_v38, %v1705_v23  ;;  %v610_v40 = vpop.f32.mrb[13].mxu1 }
 0x1da   : > { %v611_v41 = vadd.f32 %v1705_v23, %v610_v40  ;;  %v1791_v42 = vpop.f32.mrb[14].mxu1  ;;  %1804 = vmatprep.mubr.msk.bf16.mxu0 %vm535_vm2, %v673_v37 }
 0x1db   : > { %v663_v43 = vmax.f32 %v619_v39, 0.0  ;;  %v622_v44 = vadd.f32 %v1791_v42, %v1705_v23  ;;  %v613_v45 = vpop.f32.mrb[15].mxu1  ;;  %1805 = vmatmul.mubr.msk.bf16.vlgmr.msra.gmra.mrb[8].mxu0 %vm535_vm2, %v674_v36 }
 0x1dc   : > { %v661_v46 = vmax.f32 %v611_v41, 0.0  ;;  %v614_v47 = vadd.f32 %v1705_v23, %v613_v45 }
 0x1dd   : > { %v664_v48 = vmax.f32 %v622_v44, 0.0 }
 0x1de   : > { %v662_v49 = vmax.f32 %v614_v47, 0.0 }
 0x1df   : > { %v676_v50 = vpack.c.bf16 %v664_v48, %v663_v43 }
 0x1e0   : > { %v675_v51 = vpack.c.bf16 %v662_v49, %v661_v46  ;;  %v1794_v52 = vpop.f32.mrb[16].mxu1 }
 0x1e1   : > { %v635_v53 = vadd.f32 %v1794_v52, %v1705_v23  ;;  %v626_v54 = vpop.f32.mrb[17].mxu1 }
 0x1e2   : > { %1808 = vmatprep.mubr.msk.bf16.mxu0 %vm535_vm2, %v675_v51  ;;  %v627_v55 = vadd.f32 %v1705_v23, %v626_v54  ;;  %v1795_v56 = vpop.f32.mrb[18].mxu1 }
 0x1e3   : > { %1809 = vmatmul.mubr.msk.bf16.gmra.mrb[12].mxu0 %vm535_vm2, %v676_v50  ;;  %v667_v57 = vmax.f32 %v635_v53, 0.0  ;;  %v638_v58 = vadd.f32 %v1795_v56, %v1705_v23  ;;  %v629_v59 = vpop.f32.mrb[19].mxu1 }
 0x1e4   : > { %v665_v60 = vmax.f32 %v627_v55, 0.0  ;;  %v630_v61 = vadd.f32 %v1705_v23, %v629_v59 }
 0x1e5   : > { %v668_v62 = vmax.f32 %v638_v58, 0.0 }
 0x1e6   : > { %v666_v63 = vmax.f32 %v630_v61, 0.0 }
 0x1e7   : > { %v678_v0 = vpack.c.bf16 %v668_v62, %v667_v57 }
 0x1e8   : > { %v677_v1 = vpack.c.bf16 %v666_v63, %v665_v60  ;;  %v1798_v2 = vpop.f32.mrb[20].mxu1 }
 0x1e9   : > { %v651_v3 = vadd.f32 %v1798_v2, %v1705_v23  ;;  %v642_v4 = vpop.f32.mrb[21].mxu1 }
 0x1ea   : > { %1812 = vmatprep.mubr.msk.bf16.mxu0 %vm535_vm2, %v677_v1  ;;  %v643_v5 = vadd.f32 %v1705_v23, %v642_v4  ;;  %v1799_v6 = vpop.f32.mrb[22].mxu1 }
 0x1eb   : > { %1813 = vmatmul.mubr.msk.bf16.gmra.mrb[16].mxu0 %vm535_vm2, %v678_v0  ;;  %v671_v7 = vmax.f32 %v651_v3, 0.0  ;;  %v654_v8 = vadd.f32 %v1799_v6, %v1705_v23  ;;  %v645_v9 = vpop.f32.mrb[23].mxu1 }
 0x1ec   : > { %v669_v10 = vmax.f32 %v643_v5, 0.0  ;;  %v646_v11 = vadd.f32 %v1705_v23, %v645_v9 }
 0x1ed   : > { %v672_v12 = vmax.f32 %v654_v8, 0.0 }
 0x1ee   : > { %v670_v13 = vmax.f32 %v646_v11, 0.0 }
 0x1ef   : > { %v680_v14 = vpack.c.bf16 %v672_v12, %v671_v7 }
 0x1f0   : > { %v679_v15 = vpack.c.bf16 %v670_v13, %v669_v10 }
 0x1f2   : > { %1816 = vmatprep.mubr.msk.bf16.mxu0 %vm535_vm2, %v679_v15 }
 0x1f3   : > { %1817 = vmatmul.mubr.msk.bf16.gmra.mrb[20].mxu0 %vm535_vm2, %v680_v14 }
 0x2ae   : > { %v1806_v18 = vpop.f32.mrb[8].mxu0 }
 0x2af   : > { %v2173_v19 = vadd.f32 %v1806_v18, %v2170_v17  ;;  %v762_v20 = vpop.f32.mrb[9].mxu0 }
 0x2b0   : > { %v2176_v21 = vadd.f32 %v2170_v17, %v762_v20  ;;  %v1807_v22 = vpop.f32.mrb[10].mxu0 }
 0x2b1   : > { %1882 = vtanh.f32 %v2173_v19  ;;  %v2180_v23 = vadd.f32 %v1807_v22, %v2170_v17  ;;  %v765_v24 = vpop.f32.mrb[11].mxu0 }
 0x2b2   : > { %1884 = vtanh.f32 %v2176_v21  ;;  %v2185_v26 = vadd.f32 %v2170_v17, %v765_v24 }
 0x2b3   : > { %1886 = vtanh.f32 %v2180_v23 }
 0x2b4   : > { %1888 = vtanh.f32 %v2185_v26 }
 0x2b6   : > { %v1810_v28 = vpop.f32.mrb[12].mxu0 }
 0x2b7   : > { %v778_v29 = vpop.f32.mrb[13].mxu0  ;;  %v2192_v33 = vadd.f32 %v1810_v28, %v2170_v17 }
 0x2b8   : > { %v1811_v30 = vpop.f32.mrb[14].mxu0  ;;  %v2210_v39 = vadd.f32 %v2170_v17, %v778_v29 }
 0x2b9   : > { %v781_v31 = vpop.f32.mrb[15].mxu0  ;;  %1890 = vtanh.f32 %v2192_v33  ;;  %v2228_v46 = vadd.f32 %v1811_v30, %v2170_v17 }
 0x2ba   : > { %1892 = vtanh.f32 %v2210_v39  ;;  %v2241_v49 = vadd.f32 %v2170_v17, %v781_v31 }
 0x2bb   : > { %v1883_v32 = vpop.eup %1882  ;;  %1894 = vtanh.f32 %v2228_v46 }
 0x2bc   : > { %v1885_v34 = vpop.eup %1884  ;;  %v2197_v35 = vsel %vm827_vm3, %v2173_v19, %v1883_v32  ;;  %1896 = vtanh.f32 %v2241_v49 }
 0x2bd   : > { %2943 = vst [vmem:[#allocation5_spill] sm:$0xff] %v2197_v35  ;;  %928 = vrot.lane.b32.xlu1 %v2197_v35, %s2011_s10  ;;  %v2204_v36 = vsel %vm827_vm3, %v2176_v21, %v1885_v34  ;;  %v1887_v37 = vpop.eup %1886  ;;  %v880_v60 = vmul.f32 1.442695, %v2197_v35 }
 0x2be   : > { %2944 = vst [vmem:[#allocation6_spill] sm:$0xff] %v2204_v36  ;;  %924 = vrot.lane.b32.xlu0 %v2204_v36, %s2011_s10  ;;  %v1814_v38 = vpop.f32.mrb[16].mxu0  ;;  %v2219_v42 = vsel %vm827_vm3, %v2180_v23, %v1887_v37  ;;  %v1889_v44 = vpop.eup %1888  ;;  %v876_v61 = vmul.f32 1.442695, %v2204_v36 }
 0x2bf   : > { %v794_v40 = vpop.f32.mrb[17].mxu0  ;;  %2945 = vst [vmem:[#allocation7_spill] sm:$0xff] %v2219_v42  ;;  %v2235_v47 = vsel %vm827_vm3, %v2185_v26, %v1889_v44  ;;  %1898 = vpow2.f32 %v880_v60  ;;  %v882_v2 = vmul.f32 1.442695, %v2219_v42  ;;  %v2292_v4 = vadd.f32 %v1814_v38, %v2170_v17 }
 0x2c0   : > { %v2212_v41 = vpop.f32.mrb[18].mxu0  ;;  %2946 = vst [vmem:[#allocation8_spill] sm:$0xff] %v2235_v47  ;;  %1900 = vpow2.f32 %v876_v61  ;;  %v878_v3 = vmul.f32 1.442695, %v2235_v47  ;;  %v2313_v9 = vadd.f32 %v2170_v17, %v794_v40 }
 0x2c1   : > { %1217 = vrot.lane.b32.xlu1 %v2197_v35, %s2012_s12  ;;  %v797_v43 = vpop.f32.mrb[19].mxu0  ;;  %1902 = vpow2.f32 %v882_v2  ;;  %v2326_v13 = vadd.f32 %v2212_v41, %v2170_v17 }
 0x2c2   : > { %1219 = vrot.lane.b32.xlu0 %v2219_v42, %s2012_s12  ;;  %v2224_v45 = vadd.f32 %v2170_v17, %v797_v43  ;;  %1904 = vpow2.f32 %v878_v3 }
 0x2c3   : > { %v1891_v54 = vpop.eup %1890  ;;  %1906 = vtanh.f32 %v2292_v4 }
 0x2c4   : > { %v2263_v58 = vsel %vm827_vm3, %v2192_v33, %v1891_v54  ;;  %v1893_v59 = vpop.eup %1892  ;;  %1908 = vtanh.f32 %v2313_v9 }
 0x2c5   : > { %1213 = vrot.lane.b32.xlu1 %v2204_v36, %s2012_s12  ;;  %2947 = vst [vmem:[#allocation9_spill] sm:$0xff] %v2263_v58  ;;  %v2274_v62 = vsel %vm827_vm3, %v2210_v39, %v1893_v59  ;;  %v1895_v63 = vpop.eup %1894  ;;  %1910 = vtanh.f32 %v2326_v13  ;;  %v888_v20 = vmul.f32 1.442695, %v2263_v58 }
 0x2c6   : > { %926 = vrot.lane.b32.xlu0 %v2235_v47, %s2011_s10  ;;  %v1818_v48 = vpop.f32.mrb[20].mxu0  ;;  %2948 = vst [vmem:[#allocation10_spill] sm:$0xff] %v2274_v62  ;;  %v2283_v0 = vsel %vm827_vm3, %v2228_v46, %v1895_v63  ;;  %v1897_v1 = vpop.eup %1896  ;;  %1912 = vtanh.f32 %v2224_v45  ;;  %v884_v25 = vmul.f32 1.442695, %v2274_v62 }
 0x2c7   : > { %v2244_v50 = vadd.f32 %v1818_v48, %v2170_v17  ;;  %v810_v51 = vpop.f32.mrb[21].mxu0  ;;  %2949 = vst [vmem:[#allocation11_spill] sm:$0xff] %v2283_v0  ;;  %v2297_v5 = vsel %vm827_vm3, %v2241_v49, %v1897_v1  ;;  %1914 = vpow2.f32 %v888_v20  ;;  %v890_v28 = vmul.f32 1.442695, %v2283_v0 }
 0x2c8   : > { %v2247_v52 = vadd.f32 %v2170_v17, %v810_v51  ;;  %v1819_v53 = vpop.f32.mrb[22].mxu0  ;;  %1916 = vpow2.f32 %v884_v25  ;;  %v886_v37 = vmul.f32 1.442695, %v2297_v5 }
 0x2c9   : > { %930 = vrot.lane.b32.xlu1 %v2219_v42, %s2011_s10  ;;  %v2252_v55 = vadd.f32 %v1819_v53, %v2170_v17  ;;  %v813_v56 = vpop.f32.mrb[23].mxu0  ;;  %v2304_v6 = vpop.eup %1898  ;;  %1918 = vpow2.f32 %v890_v28 }
 0x2ca   : > { %1215 = vrot.lane.b32.xlu0 %v2235_v47, %s2012_s12  ;;  %v2257_v57 = vadd.f32 %v2170_v17, %v813_v56  ;;  %v2306_v7 = vpop.eup %1900  ;;  %v1006_v8 = vmul.f32 %v2304_v6, %v2304_v6  ;;  %1920 = vtanh.f32 %v2244_v50 }
 0x2cb   : > { %v2317_v10 = vpop.eup %1902  ;;  %v1004_v15 = vmul.f32 %v2306_v7, %v2306_v7  ;;  %1922 = vpow2.f32 %v886_v37 }
 0x2cc   : > { %v2319_v11 = vpop.eup %1904  ;;  %v1007_v17 = vmul.f32 %v2317_v10, %v2317_v10  ;;  %1924 = vtanh.f32 %v2247_v52 }
 0x2cd   : > { %1225 = vrot.lane.b32.xlu1 %v2263_v58, %s2012_s12  ;;  %v1907_v12 = vpop.eup %1906  ;;  %v1005_v29 = vmul.f32 %v2319_v11, %v2319_v11  ;;  %1926 = vtanh.f32 %v2252_v55 }
 0x2ce   : > { %936 = vrot.lane.b32.xlu0 %v2263_v58, %s2011_s10  ;;  %v2331_v14 = vsel %vm827_vm3, %v2292_v4, %v1907_v12  ;;  %v1909_v16 = vpop.eup %1908  ;;  %1928 = vtanh.f32 %v2257_v57 }
 0x2cf   : > { %v2348_v18 = vsel %vm827_vm3, %v2313_v9, %v1909_v16  ;;  %v1911_v22 = vpop.eup %1910  ;;  %v896_v56 = vmul.f32 1.442695, %v2331_v14 }
 0x2d0   : > { %v2360_v24 = vsel %vm827_vm3, %v2326_v13, %v1911_v22  ;;  %v1913_v30 = vpop.eup %1912  ;;  %v892_v61 = vmul.f32 1.442695, %v2348_v18 }
 0x2d1   : > { %1221 = vrot.lane.b32.xlu1 %v2274_v62, %s2012_s12  ;;  %v2376_v31 = vsel %vm827_vm3, %v2224_v45, %v1913_v30  ;;  %v2378_v32 = vpop.eup %1914  ;;  %1930 = vpow2.f32 %v896_v56  ;;  %v898_v63 = vmul.f32 1.442695, %v2360_v24 }
 0x2d2   : > { %932 = vrot.lane.b32.xlu0 %v2274_v62, %s2011_s10  ;;  %v1010_v34 = vmul.f32 %v2378_v32, %v2378_v32  ;;  %v2389_v38 = vpop.eup %1916  ;;  %1932 = vpow2.f32 %v892_v61  ;;  %v894_v12 = vmul.f32 1.442695, %v2376_v31 }
 0x2d3   : > { %v2391_v40 = vpop.eup %1918  ;;  %v1008_v44 = vmul.f32 %v2389_v38, %v2389_v38  ;;  %1934 = vpow2.f32 %v898_v63 }
 0x2d4   : > { %v1921_v41 = vpop.eup %1920  ;;  %v1011_v53 = vmul.f32 %v2391_v40, %v2391_v40  ;;  %1936 = vpow2.f32 %v894_v12 }
 0x2d5   : > { %938 = vrot.lane.b32.xlu1 %v2283_v0, %s2011_s10  ;;  %v2400_v43 = vsel %vm827_vm3, %v2244_v50, %v1921_v41  ;;  %v2410_v48 = vpop.eup %1922 }
 0x2d6   : > { %1227 = vrot.lane.b32.xlu0 %v2283_v0, %s2012_s12  ;;  %2950 = vst [vmem:[#allocation12_spill] sm:$0xff] %v2400_v43  ;;  %v1925_v51 = vpop.eup %1924  ;;  %v1009_v1 = vmul.f32 %v2410_v48, %v2410_v48  ;;  %v904_v25 = vmul.f32 1.442695, %v2400_v43 }
 0x2d7   : > { %v2420_v54 = vsel %vm827_vm3, %v2247_v52, %v1925_v51  ;;  %v1927_v59 = vpop.eup %1926 }
 0x2d8   : > { %v2432_v60 = vsel %vm827_vm3, %v2252_v55, %v1927_v59  ;;  %v1929_v2 = vpop.eup %1928  ;;  %1938 = vpow2.f32 %v904_v25  ;;  %v900_v37 = vmul.f32 1.442695, %v2420_v54 }
 0x2d9   : > { %934 = vrot.lane.b32.xlu1 %v2297_v5, %s2011_s10  ;;  %2951 = vst [vmem:[#allocation13_spill] sm:$0xff] %v2432_v60  ;;  %v2447_v3 = vsel %vm827_vm3, %v2257_v57, %v1929_v2 }
 0x2da   : > { %1223 = vrot.lane.b32.xlu0 %v2297_v5, %s2012_s12  ;;  %2952 = vst [vmem:[#allocation14_spill] sm:$0xff] %v2447_v3  ;;  %1940 = vpow2.f32 %v900_v37 }
 0x2dd   : > { %1129 = vperm.xlu1 %1872, %v2304_v6  }
 0x2de   : > { %1119 = vperm.xlu0 %1873, %v2306_v7  }
 0x2e1   : > { %1297 = vrot.lane.b32.xlu1 %v1006_v8, %s2013_s13 }
 0x2e2   : > { %1040 = vrot.lane.b32.xlu0 %v1006_v8, %s2014_s17  ;;  %v2449_v8 = vpop.eup %1930 }
 0x2e5   : > { %1124 = vperm.xlu1 %1872, %v2319_v11  }
 0x2e6   : > { %1134 = vperm.xlu0 %1873, %v2317_v10  }
 0x2e9   : > { %1233 = vrot.lane.b32.xlu1 %v2331_v14, %s2012_s12 }
 0x2ea   : > { %944 = vrot.lane.b32.xlu0 %v2331_v14, %s2011_s10 }
 0x2ed   : > { %1293 = vrot.lane.b32.xlu1 %v1004_v15, %s2013_s13 }
 0x2ee   : > { %1036 = vrot.lane.b32.xlu0 %v1004_v15, %s2014_s17  ;;  %v1014_v15 = vmul.f32 %v2449_v8, %v2449_v8 }
 0x2f1   : > { %1042 = vrot.lane.b32.xlu1 %v1007_v17, %s2014_s17 }
 0x2f2   : > { %940 = vrot.lane.b32.xlu0 %v2348_v18, %s2011_s10 }
 0x2f5   : > { %1229 = vrot.lane.b32.xlu1 %v2348_v18, %s2012_s12 }
 0x2f6   : > { %1299 = vrot.lane.b32.xlu0 %v1007_v17, %s2013_s13  ;;  %v2462_v17 = vpop.eup %1932 }
 0x2f7   : > { %v2466_v22 = vpop.eup %1934 }
 0x2f9   : > { %946 = vrot.lane.b32.xlu1 %v2360_v24, %s2011_s10 }
 0x2fa   : > { %1235 = vrot.lane.b32.xlu0 %v2360_v24, %s2012_s12 }
 0x2fd   : > { %1038 = vrot.lane.b32.xlu1 %v1005_v29, %s2014_s17 }
 0x2fe   : > { %1295 = vrot.lane.b32.xlu0 %v1005_v29, %s2013_s13  ;;  %v1012_v29 = vmul.f32 %v2462_v17, %v2462_v17 }
 0x301   : > { %942 = vrot.lane.b32.xlu1 %v2376_v31, %s2011_s10 }
 0x302   : > { %1231 = vrot.lane.b32.xlu0 %v2376_v31, %s2012_s12 }
 0x305   : > { %1149 = vperm.xlu1 %1872, %v2378_v32  }
 0x306   : > { %1048 = vrot.lane.b32.xlu0 %v1010_v34, %s2014_s17 }
 0x309   : > { %1139 = vperm.xlu1 %1872, %v2389_v38  }
 0x30a   : > { %1154 = vperm.xlu0 %1873, %v2391_v40  }
 0x30d   : > { %1305 = vrot.lane.b32.xlu1 %v1010_v34, %s2013_s13  ;;  %v2479_v34 = vpop.eup %1936 }
 0x30e   : > { %952 = vrot.lane.b32.xlu0 %v2400_v43, %s2011_s10  ;;  %v1013_v56 = vmul.f32 %v2479_v34, %v2479_v34  ;;  %v2495_v61 = vpop.eup %1938 }
 0x30f   : > { %v1018_v2 = vmul.f32 %v2495_v61, %v2495_v61  ;;  %v2510_v25 = vpop.eup %1940 }
 0x311   : > { %1241 = vrot.lane.b32.xlu1 %v2400_v43, %s2012_s12 }
 0x312   : > { %1044 = vrot.lane.b32.xlu0 %v1008_v44, %s2014_s17 }
 0x315   : > { %1301 = vrot.lane.b32.xlu1 %v1008_v44, %s2013_s13  ;;  %v906_v44 = vmul.f32 1.442695, %v2432_v60 }
 0x316   : > { %1144 = vperm.xlu0 %1873, %v2410_v48  }
 0x317   : > { %1942 = vpow2.f32 %v906_v44  ;;  %v1016_v44 = vmul.f32 %v2510_v25, %v2510_v25 }
 0x319   : > { %1050 = vrot.lane.b32.xlu1 %v1011_v53, %s2014_s17 }
 0x31a   : > { %948 = vrot.lane.b32.xlu0 %v2420_v54, %s2011_s10 }
 0x31d   : > { %1237 = vrot.lane.b32.xlu1 %v2420_v54, %s2012_s12 }
 0x31e   : > { %1307 = vrot.lane.b32.xlu0 %v1011_v53, %s2013_s13  ;;  %v1015_v53 = vmul.f32 %v2466_v22, %v2466_v22 }
 0x321   : > { %954 = vrot.lane.b32.xlu1 %v2432_v60, %s2011_s10 }
 0x322   : > { %1243 = vrot.lane.b32.xlu0 %v2432_v60, %s2012_s12 }
 0x325   : > { %1046 = vrot.lane.b32.xlu1 %v1009_v1, %s2014_s17 }
 0x326   : > { %1303 = vrot.lane.b32.xlu0 %v1009_v1, %s2013_s13  ;;  %v902_v1 = vmul.f32 1.442695, %v2447_v3 }
 0x328   : > { %1944 = vpow2.f32 %v902_v1 }
 0x329   : > { %950 = vrot.lane.b32.xlu1 %v2447_v3, %s2011_s10 }
 0x32a   : > { %1239 = vrot.lane.b32.xlu0 %v2447_v3, %s2012_s12  ;;  %s2872_s12 = scalar_lea.hbm %s2930_s8, %s1732_s24 }
 0x32d   : > { %1169 = vperm.xlu1 %1872, %v2449_v8  }
 0x32e   : > { %1056 = vrot.lane.b32.xlu0 %v1014_v15, %s2014_s17 }
 0x32f   : > { %v2460_v16 = vpop.permute.xlu1 %928 }
 0x330   : > { %v2464_v20 = vpop.permute.xlu0 %924 }
 0x331   : > { %1159 = vperm.xlu1 %1872, %v2462_v17  }
 0x332   : > { %1174 = vperm.xlu0 %1873, %v2466_v22  }
 0x333   : > { %v2471_v28 = vpop.permute.xlu1 %1217 }
 0x334   : > { %v2475_v30 = vpop.permute.xlu0 %1219 }
 0x335   : > { %1313 = vrot.lane.b32.xlu1 %v1014_v15, %s2013_s13 }
 0x336   : > { %1052 = vrot.lane.b32.xlu0 %v1012_v29, %s2014_s17 }
 0x337   : > { %v1214_v41 = vpop.permute.xlu1 %1213 }
 0x338   : > { %v2485_v51 = vpop.permute.xlu0 %926 }
 0x339   : > { %1309 = vrot.lane.b32.xlu1 %v1012_v29, %s2013_s13  ;;  %v2512_v29 = vpop.eup %1942 }
 0x33a   : > { %1164 = vperm.xlu0 %1873, %v2479_v34   ;;  %v2524_v1 = vpop.eup %1944  ;;  %v1019_v58 = vmul.f32 %v2512_v29, %v2512_v29 }
 0x33b   : > { %v2493_v59 = vpop.permute.xlu1 %930 }
 0x33c   : > { %v2497_v63 = vpop.permute.xlu0 %1215 }
 0x33d   : > { %1058 = vrot.lane.b32.xlu1 %v1015_v53, %s2014_s17 }
 0x33e   : > { %1315 = vrot.lane.b32.xlu0 %v1015_v53, %s2013_s13 }
 0x33f   : > { %v2505_v12 = vpop.permute.xlu1 %1225 }
 0x340   : > { %v2508_v15 = vpop.permute.xlu0 %936 }
 0x341   : > { %1054 = vrot.lane.b32.xlu1 %v1013_v56, %s2014_s17 }
 0x342   : > { %1311 = vrot.lane.b32.xlu0 %v1013_v56, %s2013_s13  ;;  %v2015_v56 = vmov 5  }
 0x343   : > { %v2516_v37 = vpop.permute.xlu1 %1221 }
 0x344   : > { %v2520_v53 = vpop.permute.xlu0 %932 }
 0x345   : > { %1189 = vperm.xlu1 %1872, %v2495_v61  }
 0x346   : > { %1064 = vrot.lane.b32.xlu0 %v1018_v2, %s2014_s17 }
 0x347   : > { %v2527_v0 = vpop.permute.xlu1 %938 }
 0x348   : > { %v2530_v62 = vpop.permute.xlu0 %1227 }
 0x349   : > { %1179 = vperm.xlu1 %1872, %v2510_v25  }
 0x34a   : > { %1194 = vperm.xlu0 %1873, %v2512_v29  }
 0x34b   : > { %v2538_v47 = vpop.permute.xlu1 %934 }
 0x34d   : > { %1321 = vrot.lane.b32.xlu1 %v1018_v2, %s2013_s13  ;;  %v1017_v2 = vmul.f32 %v2524_v1, %v2524_v1 }
 0x34e   : > { %1060 = vrot.lane.b32.xlu0 %v1016_v44, %s2014_s17  ;;  %1874 = vset.pattern.permute.xlu1 %v2015_v56 }
 0x351   : > { %1317 = vrot.lane.b32.xlu1 %v1016_v44, %s2013_s13  ;;  %v2540_v44 = vpop.permute.xlu0 %1223 }
 0x352   : > { %1184 = vperm.xlu0 %1873, %v2524_v1  }
 0x355   : > { %1066 = vrot.lane.b32.xlu1 %v1019_v58, %s2014_s17 }
 0x356   : > { %1319 = vrot.lane.b32.xlu0 %v1017_v2, %s2013_s13 }
 0x357   : > { %1875 = vset.pattern.permute.xlu0 %v2015_v56 }
 0x359   : > { %1062 = vrot.lane.b32.xlu1 %v1017_v2, %s2014_s17  ;;  %s2017_s17 = smov [#allocation2]  }
 0x35a   : > { %1323 = vrot.lane.b32.xlu0 %v1019_v58, %s2013_s13  ;;  %s1946_s13 = scalar_lea.vmem %s2874_s25, 2048  ;;  %s1950_s18 = sshll.u32 %s2017_s17, 4  ;;  %s1951_s18 = int_to_ptr.vmem [resolvable:$false] %s1950_s18 }
 0x35b   : > { %p1947_p11 = scmp.ne.s32.totalorder %s2874_s25, %s1946_s13  ;;  %s1952_s20 = scalar_lea.vmem %s1951_s18, 4096 }
 0x35c   : > { %v2544_v35 = vpop.permute.xlu1 %1129  ;;  %p1953_p0 = scmp.lt.s32.totalorder %s2874_s25, %s1951_s18  ;;  %p1954_p1 = scmp.lt.s32.totalorder %s1952_s20, %s1946_s13 }
 0x35d   : > { %2953 = vst [vmem:[#allocation15_spill] sm:$0xff] %v2544_v35  ;;  %v2546_v42 = vpop.permute.xlu0 %1119  ;;  %1375 = vperm.xlu1 %1874, %v2306_v7   ;;  %v860_v7 = vld [vmem:[%s2556_s21] sm:$0xff]  ;;  %p1948_p12 = pnand %p1947_p11, %p2103_p5 }
 0x35e   : > { %2954 = vst [vmem:[#allocation16_spill] sm:$0xff] %v2546_v42  ;;  %1379 = vperm.xlu0 %1875, %v2319_v11   ;;  %v972_v11 = vsub.f32 %v860_v7, %v2464_v20  ;;  %p1955_p2 = por %p1954_p1, %p1953_p0 }
 0x35f   : > { %p1949_p13 = pneg %p1948_p12 }
 0x360   : > { %v1298_v60 = vpop.permute.xlu1 %1297  ;;  %v988_v42 = vmul.f32 %v972_v11, %v972_v11  ;;  %v861_v11 = vld [vmem:[%s2556_s21 + $0x8] sm:$0xff] }
 0x361   : > { %v1041_v36 = vpop.permute.xlu0 %1040  ;;  %1383 = vperm.xlu1 %1874, %v2304_v6   ;;  %v1261_v6 = vsub.f32 %v860_v7, %v1214_v41  ;;  %p1956_p3 = pnand %p1955_p2, %p1949_p13 }
 0x362   : > { %1391 = vperm.xlu0 %1875, %v2389_v38   ;;  %v862_v38 = vld [vmem:[%s2556_s21 + $0x10] sm:$0xff] }
 0x363   : > { %v1263_v20 = vsub.f32 %v862_v38, %v2471_v28 }
 0x364   : > { %v2559_v58 = vpop.permute.xlu1 %1124 }
 0x365   : > { %2955 = vst [vmem:[#allocation17_spill] sm:$0xff] %v2559_v58  ;;  %v2562_v56 = vpop.permute.xlu0 %1134  ;;  %1387 = vperm.xlu1 %1874, %v2317_v10   ;;  %v1277_v58 = vmul.f32 %v1261_v6, %v1261_v6 }
 0x366   : > { %2956 = vst [vmem:[#allocation18_spill] sm:$0xff] %v2562_v56  ;;  %1399 = vperm.xlu0 %1875, %v2378_v32   ;;  %v863_v56 = vld [vmem:[%s2556_s21 + $0x18] sm:$0xff]  ;;  %v974_v32 = vsub.f32 %v862_v38, %v2460_v16 }
 0x368   : > { %v2567_v2 = vpop.permute.xlu1 %1233 }
 0x369   : > { %v2569_v35 = vpop.permute.xlu0 %944  ;;  %1395 = vperm.xlu1 %1874, %v2410_v48   ;;  %v1264_v48 = vsub.f32 %v863_v56, %v2475_v30 }
 0x36a   : > { %1407 = vperm.xlu0 %1875, %v2462_v17   ;;  %v975_v17 = vsub.f32 %v863_v56, %v2493_v59 }
 0x36b   : > { %v1280_v16 = vmul.f32 %v1264_v48, %v1264_v48 }
 0x36c   : > { %v1294_v3 = vpop.permute.xlu1 %1293  ;;  %v991_v28 = vmul.f32 %v975_v17, %v975_v17 }
 0x36d   : > { %v1341_v43 = vmul.f32 %v1294_v3, %v1277_v58  ;;  %1403 = vperm.xlu1 %1874, %v2391_v40   ;;  %v1037_v10 = vpop.permute.xlu0 %1036  ;;  %v990_v40 = vmul.f32 %v974_v32, %v974_v32  ;;  %v1279_v58 = vmul.f32 %v1263_v20, %v1263_v20 }
 0x36e   : > { %v1084_v41 = vmul.f32 %v1037_v10, %v988_v42  ;;  %1415 = vperm.xlu0 %1875, %v2449_v8   ;;  %v1262_v10 = vsub.f32 %v861_v11, %v2497_v63 }
 0x36f   : > { %v1343_v42 = vmul.f32 %v1298_v60, %v1279_v58  ;;  %v1086_v38 = vmul.f32 %v1041_v36, %v990_v40 }
 0x370   : > { %v1043_v7 = vpop.permute.xlu1 %1042  ;;  %v1357_v6 = vadd.f32 %v1341_v43, %v1084_v41  ;;  %v2016_v41 = vmov 0  }
 0x371   : > { %1411 = vperm.xlu1 %1874, %v2479_v34   ;;  %v2582_v3 = vpop.permute.xlu0 %940  ;;  %v1087_v43 = vmul.f32 %v1043_v7, %v991_v28  ;;  %v973_v34 = vsub.f32 %v861_v11, %v2485_v51  ;;  %v866_v28 = vld [vmem:[%s2556_s21 + $0x30] sm:$0xff] }
 0x372   : > { %1423 = vperm.xlu0 %1875, %v2510_v25   ;;  %v1454_v30 = vmul.f32 0.5, %v1357_v6  ;;  %v1359_v25 = vadd.f32 %v1343_v42, %v1086_v38  ;;  %v1267_v38 = vsub.f32 %v866_v28, %v2505_v12 }
 0x373   : > { %v989_v48 = vmul.f32 %v973_v34, %v973_v34  ;;  %v864_v34 = vld [vmem:[%s2556_s21 + $0x20] sm:$0xff] }
 0x374   : > { %v2586_v8 = vpop.permute.xlu1 %1229  ;;  %v1470_v60 = vsub.f32 %v2176_v21, %v1454_v30  ;;  %v1456_v51 = vmul.f32 0.5, %v1359_v25 }
 0x375   : > { %1419 = vperm.xlu1 %1874, %v2466_v22   ;;  %v1300_v59 = vpop.permute.xlu0 %1299 }
 0x376   : > { %v1344_v56 = vmul.f32 %v1300_v59, %v1280_v16  ;;  %1431 = vperm.xlu0 %1875, %v2495_v61   ;;  %v1278_v61 = vmul.f32 %v1262_v10, %v1262_v10  ;;  %v1472_v40 = vsub.f32 %v2173_v19, %v1456_v51  ;;  %v978_v19 = vsub.f32 %v866_v28, %v2508_v15 }
 0x378   : > { %v1360_v32 = vadd.f32 %v1344_v56, %v1087_v43  ;;  %v2592_v20 = vpop.permute.xlu1 %946  ;;  %v1283_v43 = vmul.f32 %v1267_v38, %v1267_v38  ;;  %v994_v56 = vmul.f32 %v978_v19, %v978_v19 }
 0x379   : > { %1427 = vperm.xlu1 %1874, %v2524_v1   ;;  %v2595_v36 = vpop.permute.xlu0 %1235 }
 0x37a   : > { %v1457_v22 = vmul.f32 0.5, %v1360_v32  ;;  %1877 = vset.pattern.permute.xlu0 %v2016_v41 }
 0x37b   : > { %1489 = vperm.xlu0 %1877, %v1470_v60   ;;  %v1265_v60 = vsub.f32 %v864_v34, %v2516_v37 }
 0x37c   : > { %v1039_v17 = vpop.permute.xlu1 %1038  ;;  %v1473_v63 = vsub.f32 %v2180_v23, %v1457_v22  ;;  %v976_v22 = vsub.f32 %v864_v34, %v2520_v53 }
 0x37d   : > { %v1085_v7 = vmul.f32 %v1039_v17, %v989_v48  ;;  %1435 = vperm.xlu1 %1874, %v2512_v29   ;;  %v1296_v6 = vpop.permute.xlu0 %1295 }
 0x37e   : > { %v1342_v1 = vmul.f32 %v1296_v6, %v1278_v61  ;;  %v1281_v61 = vmul.f32 %v1265_v60, %v1265_v60  ;;  %v992_v51 = vmul.f32 %v976_v22, %v976_v22 }
 0x37f   : > { %1504 = vperm.xlu0 %1877, %v1473_v63  }
 0x380   : > { %v1358_v21 = vadd.f32 %v1342_v1, %v1085_v7  ;;  %v2601_v58 = vpop.permute.xlu1 %942  ;;  %v867_v7 = vld [vmem:[%s2556_s21 + $0x38] sm:$0xff] }
 0x381   : > { %1876 = vset.pattern.permute.xlu1 %v2016_v41  ;;  %v2603_v16 = vpop.permute.xlu0 %1231  ;;  %v979_v53 = vsub.f32 %v867_v7, %v2527_v0 }
 0x382   : > { %v1455_v11 = vmul.f32 0.5, %v1358_v21  ;;  %1499 = vperm.xlu1 %1876, %v1472_v40   ;;  %v1268_v21 = vsub.f32 %v867_v7, %v2530_v62 }
 0x383   : > { %v995_v19 = vmul.f32 %v979_v53, %v979_v53 }
 0x384   : > { %v1471_v23 = vsub.f32 %v2185_v26, %v1455_v11  ;;  %v2607_v42 = vpop.permute.xlu1 %1149  ;;  %v1284_v38 = vmul.f32 %v1268_v21, %v1268_v21 }
 0x385   : > { %v1049_v29 = vpop.permute.xlu0 %1048 }
 0x386   : > { %1494 = vperm.xlu1 %1876, %v1471_v23   ;;  %v1090_v25 = vmul.f32 %v1049_v29, %v994_v56 }
 0x388   : > { %v2611_v30 = vpop.permute.xlu1 %1139 }
 0x389   : > { %v2613_v59 = vpop.permute.xlu0 %1154 }
 0x38c   : > { %v1306_v10 = vpop.permute.xlu1 %1305 }
 0x38d   : > { %v1347_v32 = vmul.f32 %v1306_v10, %v1283_v43  ;;  %v2616_v26 = vpop.permute.xlu0 %952 }
 0x38f   : > { %v1363_v12 = vadd.f32 %v1347_v32, %v1090_v25 }
 0x390   : > { %v2620_v41 = vpop.permute.xlu1 %1241 }
 0x391   : > { %v1460_v15 = vmul.f32 0.5, %v1363_v12  ;;  %v1045_v48 = vpop.permute.xlu0 %1044 }
 0x392   : > { %v1088_v6 = vmul.f32 %v1045_v48, %v992_v51 }
 0x393   : > { %v1476_v17 = vsub.f32 %v2192_v33, %v1460_v15  ;;  %v865_v33 = vld [vmem:[%s2556_s21 + $0x28] sm:$0xff] }
 0x394   : > { %v1302_v63 = vpop.permute.xlu1 %1301  ;;  %v977_v25 = vsub.f32 %v865_v33, %v2538_v47  ;;  %v1266_v0 = vsub.f32 %v865_v33, %v2540_v44 }
 0x395   : > { %v1345_v1 = vmul.f32 %v1302_v63, %v1281_v61  ;;  %1519 = vperm.xlu1 %1876, %v1476_v17   ;;  %v2624_v40 = vpop.permute.xlu0 %1144 }
 0x396   : > { %v993_v22 = vmul.f32 %v977_v25, %v977_v25  ;;  %v1282_v12 = vmul.f32 %v1266_v0, %v1266_v0 }
 0x397   : > { %v1361_v37 = vadd.f32 %v1345_v1, %v1088_v6  ;;  %v870_v6 = vld [vmem:[%s2556_s21 + $0x50] sm:$0xff] }
 0x398   : > { %v1051_v11 = vpop.permute.xlu1 %1050  ;;  %v982_v21 = vsub.f32 %v870_v6, %v2569_v35 }
 0x399   : > { %v1458_v28 = vmul.f32 0.5, %v1361_v37  ;;  %v2628_v23 = vpop.permute.xlu0 %948  ;;  %v1091_v34 = vmul.f32 %v1051_v11, %v995_v19  ;;  %v868_v11 = vld [vmem:[%s2556_s21 + $0x40] sm:$0xff] }
 0x39a   : > { %v998_v33 = vmul.f32 %v982_v21, %v982_v21  ;;  %v980_v19 = vsub.f32 %v868_v11, %v2582_v3 }
 0x39b   : > { %v1474_v29 = vsub.f32 %v2210_v39, %v1458_v28 }
 0x39c   : > { %v2632_v43 = vpop.permute.xlu1 %1237 }
 0x39d   : > { %1509 = vperm.xlu1 %1876, %v1474_v29   ;;  %v1308_v56 = vpop.permute.xlu0 %1307 }
 0x39e   : > { %v1348_v10 = vmul.f32 %v1308_v56, %v1284_v38  ;;  %v871_v56 = vld [vmem:[%s2556_s21 + $0x58] sm:$0xff] }
 0x39f   : > { %v983_v35 = vsub.f32 %v871_v56, %v2592_v20 }
 0x3a0   : > { %v1364_v62 = vadd.f32 %v1348_v10, %v1091_v34  ;;  %v2636_v32 = vpop.permute.xlu1 %954 }
 0x3a1   : > { %v2638_v60 = vpop.permute.xlu0 %1243 }
 0x3a2   : > { %v1461_v39 = vmul.f32 0.5, %v1364_v62 }
 0x3a4   : > { %v1477_v15 = vsub.f32 %v2228_v46, %v1461_v39  ;;  %v1047_v48 = vpop.permute.xlu1 %1046  ;;  %v1271_v46 = vsub.f32 %v870_v6, %v2567_v2  ;;  %v996_v2 = vmul.f32 %v980_v19, %v980_v19 }
 0x3a5   : > { %v1089_v61 = vmul.f32 %v1047_v48, %v993_v22  ;;  %v1304_v51 = vpop.permute.xlu0 %1303  ;;  %v1272_v22 = vsub.f32 %v871_v56, %v2595_v36 }
 0x3a6   : > { %v1346_v17 = vmul.f32 %v1304_v51, %v1282_v12  ;;  %1524 = vperm.xlu0 %1877, %v1477_v15   ;;  %v1287_v38 = vmul.f32 %v1271_v46, %v1271_v46  ;;  %v869_v12 = vld [vmem:[%s2556_s21 + $0x48] sm:$0xff] }
 0x3a7   : > { %v1288_v6 = vmul.f32 %v1272_v22, %v1272_v22 }
 0x3a8   : > { %v1362_v47 = vadd.f32 %v1346_v17, %v1089_v61  ;;  %v2641_v63 = vpop.permute.xlu1 %950  ;;  %v981_v17 = vsub.f32 %v869_v12, %v2601_v58 }
 0x3a9   : > { %v2643_v44 = vpop.permute.xlu0 %1239 }
 0x3aa   : > { %v1459_v7 = vmul.f32 0.5, %v1362_v47 }
 0x3ac   : > { %v1475_v1 = vsub.f32 %v2241_v49, %v1459_v7  ;;  %v2647_v37 = vpop.permute.xlu1 %1169  ;;  %v1269_v49 = vsub.f32 %v868_v11, %v2586_v8  ;;  %v999_v8 = vmul.f32 %v983_v35, %v983_v35  ;;  %v997_v11 = vmul.f32 %v981_v17, %v981_v17 }
 0x3ad   : > { %v1057_v53 = vpop.permute.xlu0 %1056 }
 0x3ae   : > { %1514 = vperm.xlu0 %1877, %v1475_v1   ;;  %v1094_v10 = vmul.f32 %v1057_v53, %v998_v33  ;;  %v1285_v62 = vmul.f32 %v1269_v49, %v1269_v49  ;;  %v1270_v1 = vsub.f32 %v869_v12, %v2603_v16  ;;  %v874_v16 = vld [vmem:[%s2556_s21 + $0x70] sm:$0xff] }
 0x3af   : > { %v1275_v35 = vsub.f32 %v874_v16, %v2620_v41 }
 0x3b0   : > { %v2652_v28 = vpop.permute.xlu1 %1159  ;;  %v1286_v33 = vmul.f32 %v1270_v1, %v1270_v1 }
 0x3b1   : > { %v2654_v29 = vpop.permute.xlu0 %1174 }
 0x3b4   : > { %v1314_v34 = vpop.permute.xlu1 %1313 }
 0x3b5   : > { %v1351_v25 = vmul.f32 %v1314_v34, %v1287_v38  ;;  %v1053_v0 = vpop.permute.xlu0 %1052 }
 0x3b6   : > { %v1092_v61 = vmul.f32 %v1053_v0, %v996_v2 }
 0x3b7   : > { %v1367_v39 = vadd.f32 %v1351_v25, %v1094_v10 }
 0x3b8   : > { %v1310_v15 = vpop.permute.xlu1 %1309 }
 0x3b9   : > { %v1464_v48 = vmul.f32 0.5, %v1367_v39  ;;  %v1349_v51 = vmul.f32 %v1310_v15, %v1285_v62  ;;  %v2662_v3 = vpop.permute.xlu0 %1164  ;;  %v872_v39 = vld [vmem:[%s2556_s21 + $0x60] sm:$0xff] }
 0x3bb   : > { %v1480_v47 = vsub.f32 %v2292_v4, %v1464_v48  ;;  %v1365_v7 = vadd.f32 %v1349_v51, %v1092_v61  ;;  %v1291_v48 = vmul.f32 %v1275_v35, %v1275_v35  ;;  %v984_v61 = vsub.f32 %v872_v39, %v2628_v23 }
 0x3bc   : > { %v1059_v20 = vpop.permute.xlu1 %1058  ;;  %v1273_v51 = vsub.f32 %v872_v39, %v2632_v43 }
 0x3bd   : > { %v1462_v53 = vmul.f32 0.5, %v1365_v7  ;;  %v1095_v36 = vmul.f32 %v1059_v20, %v999_v8  ;;  %1539 = vperm.xlu1 %1876, %v1480_v47   ;;  %v1316_v46 = vpop.permute.xlu0 %1315  ;;  %v1000_v47 = vmul.f32 %v984_v61, %v984_v61  ;;  %v875_v20 = vld [vmem:[%s2556_s21 + $0x78] sm:$0xff] }
 0x3be   : > { %v1352_v21 = vmul.f32 %v1316_v46, %v1288_v6  ;;  %v1289_v7 = vmul.f32 %v1273_v51, %v1273_v51  ;;  %v987_v43 = vsub.f32 %v875_v20, %v2636_v32 }
 0x3bf   : > { %v1478_v38 = vsub.f32 %v2313_v9, %v1462_v53  ;;  %v986_v9 = vsub.f32 %v874_v16, %v2616_v26 }
 0x3c0   : > { %v1368_v19 = vadd.f32 %v1352_v21, %v1095_v36  ;;  %v1055_v58 = vpop.permute.xlu1 %1054  ;;  %v1003_v16 = vmul.f32 %v987_v43, %v987_v43 }
 0x3c1   : > { %v1093_v49 = vmul.f32 %v1055_v58, %v997_v11  ;;  %1529 = vperm.xlu1 %1876, %v1478_v38   ;;  %v1312_v4 = vpop.permute.xlu0 %1311  ;;  %v1276_v38 = vsub.f32 %v875_v20, %v2638_v60 }
 0x3c2   : > { %v1465_v56 = vmul.f32 0.5, %v1368_v19  ;;  %v1350_v34 = vmul.f32 %v1312_v4, %v1286_v33 }
 0x3c4   : > { %v1481_v10 = vsub.f32 %v2326_v13, %v1465_v56  ;;  %v1366_v25 = vadd.f32 %v1350_v34, %v1093_v49  ;;  %v2670_v0 = vpop.permute.xlu1 %1189  ;;  %v1002_v13 = vmul.f32 %v986_v9, %v986_v9 }
 0x3c5   : > { %v1065_v2 = vpop.permute.xlu0 %1064 }
 0x3c6   : > { %v1463_v62 = vmul.f32 0.5, %v1366_v25  ;;  %1544 = vperm.xlu0 %1877, %v1481_v10   ;;  %v1098_v26 = vmul.f32 %v1065_v2, %v1002_v13  ;;  %v1292_v10 = vmul.f32 %v1276_v38, %v1276_v38 }
 0x3c8   : > { %v1479_v22 = vsub.f32 %v2224_v45, %v1463_v62  ;;  %v2676_v12 = vpop.permute.xlu1 %1179  ;;  %v873_v45 = vld [vmem:[%s2556_s21 + $0x68] sm:$0xff] }
 0x3c9   : > { %v2678_v15 = vpop.permute.xlu0 %1194  ;;  %v985_v21 = vsub.f32 %v873_v45, %v2641_v63  ;;  %v1274_v23 = vsub.f32 %v873_v45, %v2643_v44 }
 0x3ca   : > { %1534 = vperm.xlu0 %1877, %v1479_v22  }
 0x3cb   : > { %v1001_v49 = vmul.f32 %v985_v21, %v985_v21  ;;  %v1290_v4 = vmul.f32 %v1274_v23, %v1274_v23  ;;  %v2958_v23 = vld [vmem:[#allocation14_spill] sm:$0xff] }
 0x3cc   : > { %v1322_v8 = vpop.permute.xlu1 %1321 }
 0x3cd   : > { %v1355_v17 = vmul.f32 %v1322_v8, %v1291_v48  ;;  %v1061_v41 = vpop.permute.xlu0 %1060 }
 0x3ce   : > { %v1096_v53 = vmul.f32 %v1061_v41, %v1000_v47  ;;  %v1205_v41 = vsel %vm1116_vm4, %v2652_v28, %v2348_v18  ;;  %v1206_v28 = vsel %vm1116_vm4, %v2662_v3, %v2376_v31  ;;  %v1208_v31 = vsel %vm1116_vm4, %v2654_v29, %v2360_v24 }
 0x3cf   : > { %v1371_v6 = vadd.f32 %v1355_v17, %v1098_v26 }
 0x3d0   : > { %v1318_v1 = vpop.permute.xlu1 %1317 }
 0x3d1   : > { %v1353_v36 = vmul.f32 %v1318_v1, %v1289_v7  ;;  %v2684_v46 = vpop.permute.xlu0 %1184  ;;  %v1468_v56 = vmul.f32 0.5, %v1371_v6  ;;  %v1209_v1 = vsel %vm1116_vm4, %v2676_v12, %v2420_v54 }
 0x3d2   : > { %v1210_v24 = vsel %vm1116_vm4, %v2684_v46, %v2958_v23  ;;  %v2961_v46 = vld [vmem:[#allocation13_spill] sm:$0xff] }
 0x3d3   : > { %v1369_v11 = vadd.f32 %v1353_v36, %v1096_v53  ;;  %v1484_v32 = vsub.f32 %v2244_v50, %v1468_v56  ;;  %v1202_v50 = vsel %vm1116_vm4, %v2624_v40, %v2297_v5  ;;  %v1207_v5 = vsel %vm1116_vm4, %v2647_v37, %v2331_v14  ;;  %v2957_v53 = vld [vmem:[#allocation12_spill] sm:$0xff]  ;;  %v2962_v56 = vld [vmem:[#allocation7_spill] sm:$0xff] }
 0x3d4   : > { %v1067_v33 = vpop.permute.xlu1 %1066  ;;  %v1211_v54 = vsel %vm1116_vm4, %v2670_v0, %v2957_v53  ;;  %v2960_v0 = vld [vmem:[#allocation16_spill] sm:$0xff] }
 0x3d5   : > { %v1466_v19 = vmul.f32 0.5, %v1369_v11  ;;  %v1320_v58 = vpop.permute.xlu0 %1319  ;;  %v1099_v62 = vmul.f32 %v1067_v33, %v1003_v16  ;;  %v2959_v11 = vld [vmem:[#allocation6_spill] sm:$0xff] }
 0x3d6   : > { %v1354_v2 = vmul.f32 %v1320_v58, %v1290_v4  ;;  %v1197_v43 = vsel %vm1116_vm4, %v2960_v0, %v2959_v11 }
 0x3d7   : > { %v1482_v34 = vsub.f32 %v2247_v52, %v1466_v19 }
 0x3d8   : > { %v1063_v25 = vpop.permute.xlu1 %1062 }
 0x3d9   : > { %v1097_v63 = vmul.f32 %v1063_v25, %v1001_v49  ;;  %1549 = vperm.xlu1 %1876, %v1482_v34   ;;  %v1324_v44 = vpop.permute.xlu0 %1323  ;;  %v1212_v49 = vsel %vm1116_vm4, %v2678_v15, %v2961_v46  ;;  %v2963_v34 = vld [vmem:[#allocation18_spill] sm:$0xff] }
 0x3da   : > { %v1356_v9 = vmul.f32 %v1324_v44, %v1292_v10  ;;  %v1200_v16 = vsel %vm1116_vm4, %v2963_v34, %v2962_v56  ;;  %v2965_v44 = vld [vmem:[#allocation15_spill] sm:$0xff] }
 0x3db   : > { %v1370_v60 = vadd.f32 %v1354_v2, %v1097_v63  ;;  %v2964_v63 = vld [vmem:[#allocation5_spill] sm:$0xff] }
 0x3dc   : > { %v1372_v35 = vadd.f32 %v1356_v9, %v1099_v62  ;;  %v1376_v39 = vpop.permute.xlu1 %1375  ;;  %v1199_v62 = vsel %vm1116_vm4, %v2965_v44, %v2964_v63 }
 0x3dd   : > { %v1467_v22 = vmul.f32 0.5, %v1370_v60  ;;  %1559 = vperm.xlu1 %1876, %v1484_v32   ;;  %v1380_v13 = vpop.permute.xlu0 %1379  ;;  %v1438_v33 = vsel %vm1373_vm5, %v1376_v39, %v1197_v43  ;;  %v2967_v39 = vld [vmem:[#allocation17_spill] sm:$0xff] }
 0x3de   : > { %v1469_v52 = vmul.f32 0.5, %v1372_v35  ;;  %v2966_v35 = vld [vmem:[#allocation8_spill] sm:$0xff] }
 0x3df   : > { %v1483_v48 = vsub.f32 %v2257_v57, %v1467_v22  ;;  %v1198_v22 = vsel %vm1116_vm4, %v2967_v39, %v2966_v35 }
 0x3e0   : > { %v1384_v61 = vpop.permute.xlu1 %1383  ;;  %v1485_v8 = vsub.f32 %v2252_v55, %v1469_v52 }
 0x3e1   : > { %1554 = vperm.xlu0 %1877, %v1483_v48   ;;  %v2693_v51 = vpop.permute.xlu0 %1391  ;;  %v1440_v9 = vsel %vm1373_vm5, %v1384_v61, %v1199_v62  ;;  %v1439_v48 = vsel %vm1373_vm5, %v1380_v13, %v1198_v22  ;;  %v2968_v61 = vld [vmem:[#allocation9_spill] sm:$0xff]  ;;  %v2969_v13 = vld [vmem:[#allocation10_spill] sm:$0xff] }
 0x3e4   : > { %v1388_v26 = vpop.permute.xlu1 %1387 }
 0x3e5   : > { %1564 = vperm.xlu0 %1877, %v1485_v8   ;;  %v1400_v17 = vpop.permute.xlu0 %1399  ;;  %v1441_v25 = vsel %vm1373_vm5, %v1388_v26, %v1200_v16  ;;  %v1203_v26 = vsel %vm1116_vm4, %v2607_v42, %v2968_v61 }
 0x3e8   : > { %v1396_v57 = vpop.permute.xlu1 %1395 }
 0x3e9   : > { %v2708_v55 = vsel %vm1373_vm5, %v1396_v57, %v1202_v50  ;;  %v1408_v47 = vpop.permute.xlu0 %1407  ;;  %v1444_v50 = vsel %vm1373_vm5, %v1400_v17, %v1203_v26 }
 0x3ea   : > { %v2712_v7 = vsel %vm1373_vm5, %v1408_v47, %v1205_v41  ;;  %v1201_v47 = vsel %vm1116_vm4, %v2611_v30, %v2969_v13 }
 0x3ec   : > { %v1404_v6 = vpop.permute.xlu1 %1403 }
 0x3ed   : > { %v1416_v40 = vpop.permute.xlu0 %1415 }
 0x3ee   : > { %v2720_v18 = vsel %vm1373_vm5, %v1416_v40, %v1207_v5  ;;  %v1442_v5 = vsel %vm1373_vm5, %v2693_v51, %v1201_v47  ;;  %v2970_v40 = vld [vmem:[#allocation11_spill] sm:$0xff] }
 0x3f0   : > { %v1412_v45 = vpop.permute.xlu1 %1411 }
 0x3f1   : > { %v2732_v14 = vsel %vm1373_vm5, %v1412_v45, %v1206_v28  ;;  %v1424_v37 = vpop.permute.xlu0 %1423  ;;  %v1204_v28 = vsel %vm1116_vm4, %v2613_v59, %v2970_v40 }
 0x3f2   : > { %v2736_v20 = vsel %vm1373_vm5, %v1424_v37, %v1209_v1  ;;  %v1445_v45 = vsel %vm1373_vm5, %v1404_v6, %v1204_v28 }
 0x3f4   : > { %v1420_v3 = vpop.permute.xlu1 %1419 }
 0x3f5   : > { %v1449_v12 = vsel %vm1373_vm5, %v1420_v3, %v1208_v31  ;;  %v1432_v36 = vpop.permute.xlu0 %1431 }
 0x3f6   : > { %v2751_v21 = vsel %vm1373_vm5, %v1432_v36, %v1211_v54 }
 0x3f8   : > { %v1428_v29 = vpop.permute.xlu1 %1427 }
 0x3f9   : > { %v2766_v38 = vsel %vm1373_vm5, %v1428_v29, %v1210_v24 }
 0x3fa   : > { %v1490_v19 = vpop.permute.xlu0 %1489 }
 0x3fb   : > { %v1567_v58 = vsel %vm1486_vm6, %v1490_v19, %v1438_v33 }
 0x3fc   : > { %1583 = vst [vmem:[%s2776_s23] sm:$0xff] %v1567_v58  ;;  %v1436_v4 = vpop.permute.xlu1 %1435 }
 0x3fd   : > { %v1453_v10 = vsel %vm1373_vm5, %v1436_v4, %v1212_v49 }
 0x3fe   : > { %v1505_v15 = vpop.permute.xlu0 %1504 }
 0x3ff   : > { %v1570_v2 = vsel %vm1486_vm6, %v1505_v15, %v1441_v25 }
 0x400   : > { %1586 = vst [vmem:[%s2776_s23 + $0x18] sm:$0xff] %v1570_v2 }
 0x401   : > { %v1500_v32 = vpop.permute.xlu1 %1499 }
 0x402   : > { %v1569_v60 = vsel %vm1486_vm6, %v1500_v32, %v1440_v9 }
 0x403   : > { %1585 = vst [vmem:[%s2776_s23 + $0x10] sm:$0xff] %v1569_v60 }
 0x405   : > { %v1495_v52 = vpop.permute.xlu1 %1494 }
 0x406   : > { %v1568_v8 = vsel %vm1486_vm6, %v1495_v52, %v1439_v48 }
 0x407   : > { %1584 = vst [vmem:[%s2776_s23 + $0x8] sm:$0xff] %v1568_v8 }
 0x414   : > { %v1520_v57 = vpop.permute.xlu1 %1519 }
 0x415   : > { %v1573_v41 = vsel %vm1486_vm6, %v1520_v57, %v1444_v50 }
 0x416   : > { %1589 = vst [vmem:[%s2776_s23 + $0x30] sm:$0xff] %v1573_v41 }
 0x41c   : > { %v1510_v42 = vpop.permute.xlu1 %1509 }
 0x41d   : > { %v1571_v17 = vsel %vm1486_vm6, %v1510_v42, %v1442_v5 }
 0x41e   : > { %1587 = vst [vmem:[%s2776_s23 + $0x20] sm:$0xff] %v1571_v17 }
 0x425   : > { %v1525_v30 = vpop.permute.xlu0 %1524 }
 0x426   : > { %v1574_v1 = vsel %vm1486_vm6, %v1525_v30, %v1445_v45 }
 0x427   : > { %1590 = vst [vmem:[%s2776_s23 + $0x38] sm:$0xff] %v1574_v1 }
 0x42d   : > { %v1515_v51 = vpop.permute.xlu0 %1514 }
 0x42e   : > { %v1572_v37 = vsel %vm1486_vm6, %v1515_v51, %v2708_v55 }
 0x42f   : > { %1588 = vst [vmem:[%s2776_s23 + $0x28] sm:$0xff] %v1572_v37 }
 0x43c   : > { %v1540_v31 = vpop.permute.xlu1 %1539 }
 0x43d   : > { %v1577_v59 = vsel %vm1486_vm6, %v1540_v31, %v2720_v18 }
 0x43e   : > { %1593 = vst [vmem:[%s2776_s23 + $0x50] sm:$0xff] %v1577_v59 }
 0x440   : > { %v1530_v6 = vpop.permute.xlu1 %1529 }
 0x441   : > { %v1575_v3 = vsel %vm1486_vm6, %v1530_v6, %v2712_v7 }
 0x442   : > { %1591 = vst [vmem:[%s2776_s23 + $0x40] sm:$0xff] %v1575_v3 }
 0x445   : > { %v1545_v53 = vpop.permute.xlu0 %1544 }
 0x446   : > { %v1578_v55 = vsel %vm1486_vm6, %v1545_v53, %v1449_v12 }
 0x447   : > { %1594 = vst [vmem:[%s2776_s23 + $0x58] sm:$0xff] %v1578_v55 }
 0x449   : > { %v1535_v54 = vpop.permute.xlu0 %1534 }
 0x44a   : > { %v1576_v18 = vsel %vm1486_vm6, %v1535_v54, %v2732_v14 }
 0x44b   : > { %1592 = vst [vmem:[%s2776_s23 + $0x48] sm:$0xff] %v1576_v18 }
 0x458   : > { %v1550_v36 = vpop.permute.xlu1 %1549 }
 0x459   : > { %v1579_v7 = vsel %vm1486_vm6, %v1550_v36, %v2736_v20 }
 0x45a   : > { %1595 = vst [vmem:[%s2776_s23 + $0x60] sm:$0xff] %v1579_v7 }
 0x45c   : > { %v1560_v23 = vpop.permute.xlu1 %1559 }
 0x45d   : > { %v1581_v12 = vsel %vm1486_vm6, %v1560_v23, %v2751_v21 }
 0x45e   : > { %1597 = vst [vmem:[%s2776_s23 + $0x70] sm:$0xff] %v1581_v12 }
 0x460   : > { %v1555_v24 = vpop.permute.xlu0 %1554 }
 0x461   : > { %v1580_v14 = vsel %vm1486_vm6, %v1555_v24, %v2766_v38 }
 0x462   : > { %1596 = vst [vmem:[%s2776_s23 + $0x68] sm:$0xff] %v1580_v14 }
 0x464   : > { %v1565_v20 = vpop.permute.xlu0 %1564 }
 0x465   : > { %v1582_v21 = vsel %vm1486_vm6, %v1565_v20, %v1453_v10 }
 0x466   : > { %1598 = vst [vmem:[%s2776_s23 + $0x78] sm:$0xff] %v1582_v21 }
 0x467   : > { %1959 = shalt.err (!%p1956_p3)
}
 0x468   : > { %s1960_s21 = scalar_lea.hbm %s2872_s12, 2048  ;;  %s1964_s23 = scalar_lea.hbm %s2930_s8, 4096 }
 0x469   : > { %p1961_p4 = scmp.ne.s32.totalorder %s2872_s12, %s1960_s21  ;;  %p1965_p9 = scmp.lt.u32.totalorder %s2872_s12, %s2930_s8 }
 0x46a   : > { %p1966_p10 = scmp.lt.u32.totalorder %s1964_s23, %s1960_s21  ;;  %p1968_p12 = scmp.lt.u32.totalorder %s1960_s21, %s2872_s12 }
 0x46b   : > { %p1962_p7 = pnand %p1961_p4, %p2103_p5 }
 0x46c   : > { %p1967_p11 = por %p1966_p10, %p1965_p9 }
 0x46d   : > { %p1963_p8 = pneg %p1962_p7 }
 0x46e   : > { %p1969_p13 = por %p1968_p12, %p1967_p11 }
 0x470   : > { %p1970_p0 = pnand %p1969_p13, %p1963_p8 }
 0x472   : > { %1973 = shalt.err (!%p1970_p0)
}
 0x473   : > { %s2018_s10 = smov 128   ;;  %s2019_s13 = smov 8  }
 0x474   : > { %1824 = dma.vmem_to_hbm [thread:$0]  (%p2103_p5), %s2874_s25, 2048, %s2872_s12, %s2881_s9, %s2018_s10, %s2018_s10, %s2019_s13  }
 0x475 PF: > { %p1830_p1 = scmp.ge.s32.totalorder %s2008_s30, 2  ;;  %s1628_s17 = sand.u32 1, %s1996_s27  }
 0x476   : > { %s1629_s18 = scalar_lea.sflag [#allocation3], %s1628_s17 }
 0x477   : > { %p1827_p2 = pnand %p1830_p1, %p2107_p6 }
 0x479   : > { %1991 = dma.done.wait (!%p1827_p2), %s1629_s18, 2048  }
 0x47a   : > { %1993 = vsyncadd (!%p1827_p2), %s1629_s18, 4294965248  ;;  %p18_p3 = scmp.ge.s32.totalorder %s2090_s11, 4   ;;  %s2971_s27 = smov %s2000_s28 }
 0x47b   : > { %s2972_s28 = smov %s2004_s29  ;;  %s2973_s29 = smov %s2101_s14 }
 0x47c   : > { %s2974_s30 = smov %s2090_s11  ;;  %20 = sbr.rel (!%p18_p3) target bundleno = 3 (0x3), region = 90 }
 0x483   :  { %1634 = vsyncpa [#allocation3], 1 }
 0x484   :  { %1636 = vsyncpa [#allocation3 + $0x1], 1 }

</bundles_post_ra>
